<compile_context>
chip_gen: v7x
topology: tpu7x:2x2x1
jax: 0.10.0
libtpu: 0.0.40
codegen_flags: <defaults>
</compile_context>

<pallas_src>
import functools

import jax
import jax.numpy as jnp
from jax.experimental import pallas as pl
from jax.experimental.pallas import tpu as pltpu

NEG_SLOPE = 0.2
BN_EPS = 1e-5
RHO = 0.1


# --------------------------- Pallas kernels ---------------------------------

def _conv_pool_kernel(x_ref, w_ref, b_ref, o_ref, *, neg_slope):
    """Fused conv-as-matmul + bias + LeakyReLU + 2x2/2 maxpool.

    x_ref: (4, tm, K)  bf16  im2col patches; leading axis = pool-window offset
    w_ref: (K, Cout)   bf16
    b_ref: (1, Cout)   f32
    o_ref: (tm, Cout)  f32   pooled output rows (n, hp, wp)

    maxpool(LeakyReLU(conv + b)) == LeakyReLU(max_k(conv_k) + b) because the
    bias is shared across the window and LeakyReLU is monotone.
    """
    w = w_ref[...]
    m = jnp.dot(x_ref[0], w, preferred_element_type=jnp.float32)
    for k in range(1, 4):
        m = jnp.maximum(m, jnp.dot(x_ref[k], w,
                                   preferred_element_type=jnp.float32))
    y = m + b_ref[...]
    o_ref[...] = jnp.where(y > 0, y, neg_slope * y)


def _head_kernel(x_ref, w3_ref, b3_ref, w1_ref, b1_ref, s2_ref, t2_ref,
                 w2_ref, b2_ref, o_ref, *, neg_slope):
    """conv3(=dense)+LeakyReLU -> fc1 (BN1 pre-folded) -> BN2+LeakyReLU -> fc2.

    Keeps the (N,120)/(N,84) intermediates entirely in VMEM/vregs.
    """
    h = jnp.dot(x_ref[...], w3_ref[...],
                preferred_element_type=jnp.float32) + b3_ref[...]
    h = jnp.where(h > 0, h, neg_slope * h)
    h = jnp.dot(h, w1_ref[...],
                preferred_element_type=jnp.float32) + b1_ref[...]
    h = h * s2_ref[...] + t2_ref[...]
    h = jnp.where(h > 0, h, neg_slope * h)
    o_ref[...] = jnp.dot(h, w2_ref[...],
                         preferred_element_type=jnp.float32) + b2_ref[...]


# --------------------------- wrappers ----------------------------------------

def _row_block(mq, target=256):
    """Largest multiple-of-8 divisor of mq that is <= target (else full block)."""
    if mq <= target:
        return mq, 1
    best = None
    for tm in range(8, target + 1, 8):
        if mq % tm == 0:
            best = tm
    if best is None:
        return mq, 1
    return best, mq // best


def _im2col_pooled(x, kh, kw, pad):
    """NHWC im2col with rows grouped by 2x2 pooling window.

    Returns cols of shape (4, N*Hq*Wq, kh*kw*C): axis 0 enumerates the pool
    window offset (dy, dx), rows are pooled output positions (n, hq, wq),
    columns are (i, j, c).  One fused XLA gather; no activation transposes.
    """
    n, h, w, c = x.shape
    if pad:
        x = jnp.pad(x, ((0, 0), (pad, pad), (pad, pad), (0, 0)))
    ho, wo = h + 2 * pad - kh + 1, w + 2 * pad - kw + 1
    hq, wq = ho // 2, wo // 2
    k = kh * kw * c
    patches = [x[:, i:i + ho, j:j + wo, :] for i in range(kh) for j in range(kw)]
    cols = jnp.stack(patches, axis=3)                 # (n, ho, wo, kh*kw, c)
    cols = cols.reshape(n, hq, 2, wq, 2, k)           # oh=(hq,dy), ow=(wq,dx)
    cols = cols.transpose(2, 4, 0, 1, 3, 5)           # (dy, dx, n, hq, wq, k)
    return cols.reshape(4, n * hq * wq, k), hq, wq


def conv_lrelu_pool(x, w, b, pad):
    """x: NHWC.  w: torch layout (Cout, Cin, KH, KW).  Returns pooled NHWC."""
    n = x.shape[0]
    cout, cin, kh, kw = w.shape
    cols, hq, wq = _im2col_pooled(x, kh, kw, pad)
    mq, k = cols.shape[1], cols.shape[2]
    wmat = w.transpose(2, 3, 1, 0).reshape(k, cout)   # columns (i, j, cin)
    cols = cols.astype(jnp.bfloat16)                  # bf16 MXU operands,
    wmat = wmat.astype(jnp.bfloat16)                  # f32 accumulation
    b2d = b.reshape(1, cout).astype(jnp.float32)
    tm, g = _row_block(mq)
    out = pl.pallas_call(
        functools.partial(_conv_pool_kernel, neg_slope=NEG_SLOPE),
        out_shape=jax.ShapeDtypeStruct((mq, cout), jnp.float32),
        grid=(g,),
        in_specs=[
            pl.BlockSpec((4, tm, k), lambda i: (0, i, 0)),
            pl.BlockSpec((k, cout), lambda i: (0, 0)),
            pl.BlockSpec((1, cout), lambda i: (0, 0)),
        ],
        out_specs=pl.BlockSpec((tm, cout), lambda i: (i, 0)),
        compiler_params=pltpu.CompilerParams(
            dimension_semantics=("parallel",)),
    )(cols, wmat, b2d)
    return out.reshape(n, hq, wq, cout)


def pallas_head(x3, w3, b3, w1, b1, s2, t2, w2, b2):
    """Single fused kernel for conv3 + (BN1-folded) fc1 + BN2/LeakyReLU + fc2."""
    n = x3.shape[0]
    args = (x3, w3, b3.reshape(1, -1), w1, b1.reshape(1, -1),
            s2.reshape(1, -1), t2.reshape(1, -1), w2, b2.reshape(1, -1))
    args = tuple(a.astype(jnp.float32) for a in args)
    in_specs = [pl.BlockSpec(a.shape, lambda i: (0, 0)) for a in args]
    return pl.pallas_call(
        functools.partial(_head_kernel, neg_slope=NEG_SLOPE),
        out_shape=jax.ShapeDtypeStruct((n, w2.shape[1]), jnp.float32),
        grid=(1,),
        in_specs=in_specs,
        out_specs=pl.BlockSpec((n, w2.shape[1]), lambda i: (0, 0)),
    )(*args)


# --------------------------- params / masks ---------------------------------

def make_mask(key, out_f, in_f, rho=RHO):
    """Structured-DropConnect masks: 1/rho masks, each zeroing a disjoint rho-fraction."""
    n = out_f * in_f
    loops = int(round(1.0 / rho))
    perm = jax.random.permutation(key, n)
    chunk = int(rho * n)
    masks = []
    for l in range(loops):
        m = jnp.ones((n,), jnp.float32)
        m = m.at[perm[l * chunk:(l + 1) * chunk]].set(0.0)
        masks.append(m.reshape(out_f, in_f))
    return jnp.stack(masks, axis=0)                    # (1/rho, out_f, in_f)


def _uniform(key, shape, bound):
    return jax.random.uniform(key, shape, jnp.float32, -bound, bound)


def init_params(key):
    ks = jax.random.split(key, 12)
    p = {}
    p["conv1_w"] = _uniform(ks[0], (6, 1, 5, 5), 1.0 / (1 * 25) ** 0.5)
    p["conv1_b"] = _uniform(ks[1], (6,), 1.0 / (1 * 25) ** 0.5)
    p["conv2_w"] = _uniform(ks[2], (16, 6, 5, 5), 1.0 / (6 * 25) ** 0.5)
    p["conv2_b"] = _uniform(ks[3], (16,), 1.0 / (6 * 25) ** 0.5)
    p["conv3_w"] = _uniform(ks[4], (120, 16, 5, 5), 1.0 / (16 * 25) ** 0.5)
    p["conv3_b"] = _uniform(ks[5], (120,), 1.0 / (16 * 25) ** 0.5)
    p["fc1_w"] = _uniform(ks[6], (84, 120), 1.0 / 120 ** 0.5)
    p["fc1_b"] = _uniform(ks[7], (84,), 1.0 / 120 ** 0.5)
    p["fc2_w"] = _uniform(ks[8], (10, 84), 1.0 / 84 ** 0.5)
    p["fc2_b"] = _uniform(ks[9], (10,), 1.0 / 84 ** 0.5)
    # BatchNorm1d defaults (fresh module, eval mode): gamma=1, beta=0, mean=0, var=1
    p["bn1_gamma"] = jnp.ones((120,), jnp.float32)
    p["bn1_beta"] = jnp.zeros((120,), jnp.float32)
    p["bn1_mean"] = jnp.zeros((120,), jnp.float32)
    p["bn1_var"] = jnp.ones((120,), jnp.float32)
    p["bn2_gamma"] = jnp.ones((84,), jnp.float32)
    p["bn2_beta"] = jnp.zeros((84,), jnp.float32)
    p["bn2_mean"] = jnp.zeros((84,), jnp.float32)
    p["bn2_var"] = jnp.ones((84,), jnp.float32)
    p["mask1"] = make_mask(ks[10], 84, 120)            # (10, 84, 120)
    p["mask2"] = make_mask(ks[11], 10, 84)             # (10, 10, 84)
    return p


# --------------------------- model forward ----------------------------------

def lenet_forward(params, x, index):
    # NCHW -> NHWC once (Cin=1, effectively free).
    xh = jnp.transpose(x, (0, 2, 3, 1))

    # conv1 block and conv2 block, each a single fused Pallas kernel.
    out = conv_lrelu_pool(xh, params["conv1_w"], params["conv1_b"], pad=2)   # (N,14,14,6)
    out = conv_lrelu_pool(out, params["conv2_w"], params["conv2_b"], pad=0)  # (N,5,5,16)

    # conv3 has 1x1 output spatial -> it is a dense layer on the NHWC flatten.
    x3 = out.reshape(out.shape[0], -1)                                       # (N, 400)
    w3 = params["conv3_w"].transpose(2, 3, 1, 0).reshape(-1, params["conv3_w"].shape[0])

    # Eval-mode BN1 (no activation) folded algebraically into fc1.
    s1 = params["bn1_gamma"] * jax.lax.rsqrt(params["bn1_var"] + BN_EPS)
    t1 = params["bn1_beta"] - params["bn1_mean"] * s1
    w1m = params["fc1_w"] * params["mask1"][index]       # DropConnect eval path
    w1p = (w1m * s1[None, :]).T                          # (120, 84)
    b1p = params["fc1_b"] + w1m @ t1                     # (84,)

    # BN2 affine (LeakyReLU applied inside the head kernel).
    s2 = params["bn2_gamma"] * jax.lax.rsqrt(params["bn2_var"] + BN_EPS)
    t2 = params["bn2_beta"] - params["bn2_mean"] * s2

    w2p = (params["fc2_w"] * params["mask2"][index]).T   # (84, 10)

    return pallas_head(x3, w3, params["conv3_b"], w1p, b1p, s2, t2, w2p,
                       params["fc2_b"])                  # (N, 10)


# --------------------------- main --------------------------------------------

if __name__ == "__main__":
    key = jax.random.PRNGKey(0)
    k_x, k_p = jax.random.split(key)
    # LeNet-5 geometry requires 28x28 single-channel inputs; batch kept small.
    x = jax.random.normal(k_x, (2, 1, 28, 28), jnp.float32)
    params = init_params(k_p)
    index = jnp.array(3, dtype=jnp.int32)   # traced -> no recompile per mask index

    fwd = jax.jit(lenet_forward)
    out = jax.block_until_ready(fwd(params, x, index))
    assert out.shape == (2, 10) and out.dtype == jnp.float32
    print("KERNEL_OK")
</pallas_src>

<mosaic_0001>
module attributes {stable_mosaic.version = 11 : i64} {
  func.func @_conv_pool_kernel(%arg0: i32, %arg1: memref<4x56x25xbf16, #tpu.memory_space<vmem>>, %arg2: memref<25x6xbf16, #tpu.memory_space<vmem>>, %arg3: memref<1x6xf32, #tpu.memory_space<vmem>>, %arg4: memref<56x6xf32, #tpu.memory_space<vmem>>) attributes {dimension_semantics = [#tpu.dimension_semantics<parallel>], iteration_bounds = array<i64: 7>, scalar_prefetch = 0 : i64, scratch_operands = 0 : i64, tpu.core_type = #tpu.core_type<tc>, window_params = [{transform_indices = @transform_0, window_bounds = array<i64: 4, 56, 25>}, {pipeline_mode = #tpu.pipeline_mode<synchronous>, transform_indices = @transform_1, window_bounds = array<i64: 25, 6>}, {pipeline_mode = #tpu.pipeline_mode<synchronous>, transform_indices = @transform_2, window_bounds = array<i64: 1, 6>}, {transform_indices = @transform_3, window_bounds = array<i64: 56, 6>}]} {
    %c0 = arith.constant 0 : index
    %c0_0 = arith.constant 0 : index
    %0 = vector.load %arg2[%c0, %c0_0] : memref<25x6xbf16, #tpu.memory_space<vmem>>, vector<25x6xbf16>
    %c0_1 = arith.constant 0 : index
    %c0_2 = arith.constant 0 : index
    %c0_3 = arith.constant 0 : index
    %1 = vector.load %arg1[%c0_1, %c0_2, %c0_3] : memref<4x56x25xbf16, #tpu.memory_space<vmem>>, vector<1x56x25xbf16>
    %2 = vector.shape_cast %1 : vector<1x56x25xbf16> to vector<56x25xbf16>
    %cst = arith.constant dense<0.000000e+00> : vector<56x6xf32>
    %3 = tpu.matmul %2, %0, %cst {dimension_numbers = #tpu.dot_dimension_numbers<[1], [0], [0], [1], [0, 0, 1, 1], [], []>} : vector<56x25xbf16>, vector<25x6xbf16>, vector<56x6xf32> -> vector<56x6xf32>
    %c1 = arith.constant 1 : index
    %c0_4 = arith.constant 0 : index
    %c0_5 = arith.constant 0 : index
    %4 = vector.load %arg1[%c1, %c0_4, %c0_5] : memref<4x56x25xbf16, #tpu.memory_space<vmem>>, vector<1x56x25xbf16>
    %5 = vector.shape_cast %4 : vector<1x56x25xbf16> to vector<56x25xbf16>
    %cst_6 = arith.constant dense<0.000000e+00> : vector<56x6xf32>
    %6 = tpu.matmul %5, %0, %cst_6 {dimension_numbers = #tpu.dot_dimension_numbers<[1], [0], [0], [1], [0, 0, 1, 1], [], []>} : vector<56x25xbf16>, vector<25x6xbf16>, vector<56x6xf32> -> vector<56x6xf32>
    %7 = arith.maximumf %3, %6 : vector<56x6xf32>
    %c2 = arith.constant 2 : index
    %c0_7 = arith.constant 0 : index
    %c0_8 = arith.constant 0 : index
    %8 = vector.load %arg1[%c2, %c0_7, %c0_8] : memref<4x56x25xbf16, #tpu.memory_space<vmem>>, vector<1x56x25xbf16>
    %9 = vector.shape_cast %8 : vector<1x56x25xbf16> to vector<56x25xbf16>
    %cst_9 = arith.constant dense<0.000000e+00> : vector<56x6xf32>
    %10 = tpu.matmul %9, %0, %cst_9 {dimension_numbers = #tpu.dot_dimension_numbers<[1], [0], [0], [1], [0, 0, 1, 1], [], []>} : vector<56x25xbf16>, vector<25x6xbf16>, vector<56x6xf32> -> vector<56x6xf32>
    %11 = arith.maximumf %7, %10 : vector<56x6xf32>
    %c3 = arith.constant 3 : index
    %c0_10 = arith.constant 0 : index
    %c0_11 = arith.constant 0 : index
    %12 = vector.load %arg1[%c3, %c0_10, %c0_11] : memref<4x56x25xbf16, #tpu.memory_space<vmem>>, vector<1x56x25xbf16>
    %13 = vector.shape_cast %12 : vector<1x56x25xbf16> to vector<56x25xbf16>
    %cst_12 = arith.constant dense<0.000000e+00> : vector<56x6xf32>
    %14 = tpu.matmul %13, %0, %cst_12 {dimension_numbers = #tpu.dot_dimension_numbers<[1], [0], [0], [1], [0, 0, 1, 1], [], []>} : vector<56x25xbf16>, vector<25x6xbf16>, vector<56x6xf32> -> vector<56x6xf32>
    %15 = arith.maximumf %11, %14 : vector<56x6xf32>
    %c0_13 = arith.constant 0 : index
    %c0_14 = arith.constant 0 : index
    %16 = vector.load %arg3[%c0_13, %c0_14] : memref<1x6xf32, #tpu.memory_space<vmem>>, vector<1x6xf32>
    %17 = vector.broadcast %16 : vector<1x6xf32> to vector<56x6xf32>
    %18 = arith.addf %15, %17 : vector<56x6xf32>
    %cst_15 = arith.constant 0.000000e+00 : f32
    %19 = vector.broadcast %cst_15 : f32 to vector<56x6xf32>
    %20 = arith.cmpf ogt, %18, %19 : vector<56x6xf32>
    %cst_16 = arith.constant 2.000000e-01 : f32
    %21 = vector.broadcast %cst_16 : f32 to vector<56x6xf32>
    %22 = arith.mulf %21, %18 : vector<56x6xf32>
    %23 = arith.select %20, %18, %22 : vector<56x6xi1>, vector<56x6xf32>
    %c0_17 = arith.constant 0 : index
    %c0_18 = arith.constant 0 : index
    %24 = vector.load %arg4[%c0_17, %c0_18] : memref<56x6xf32, #tpu.memory_space<vmem>>, vector<56x6xf32>
    tpu.vector_store %arg4[%c0_17, %c0_18], %23 {strides = array<i32>} : memref<56x6xf32, #tpu.memory_space<vmem>>, vector<56x6xf32>,
    return
  }
  func.func @transform_0(%arg0: i32) -> (i32, i32, i32) {
    %c0_i32 = arith.constant 0 : i32
    %c0_i32_0 = arith.constant 0 : i32
    %c0_i32_1 = arith.constant 0 : i32
    return %c0_i32, %arg0, %c0_i32_0 : i32, i32, i32
  }
  func.func @transform_1(%arg0: i32) -> (i32, i32) {
    %c0_i32 = arith.constant 0 : i32
    %c0_i32_0 = arith.constant 0 : i32
    %c0_i32_1 = arith.constant 0 : i32
    return %c0_i32, %c0_i32_0 : i32, i32
  }
  func.func @transform_2(%arg0: i32) -> (i32, i32) {
    %c0_i32 = arith.constant 0 : i32
    %c0_i32_0 = arith.constant 0 : i32
    %c0_i32_1 = arith.constant 0 : i32
    return %c0_i32, %c0_i32_0 : i32, i32
  }
  func.func @transform_3(%arg0: i32) -> (i32, i32) {
    %c0_i32 = arith.constant 0 : i32
    %c0_i32_0 = arith.constant 0 : i32
    return %arg0, %c0_i32 : i32, i32
  }
}

module attributes {stable_mosaic.version = 11 : i64} {
  func.func @_conv_pool_kernel(%arg0: i32, %arg1: memref<4x50x150xbf16, #tpu.memory_space<vmem>>, %arg2: memref<150x16xbf16, #tpu.memory_space<vmem>>, %arg3: memref<1x16xf32, #tpu.memory_space<vmem>>, %arg4: memref<50x16xf32, #tpu.memory_space<vmem>>) attributes {dimension_semantics = [#tpu.dimension_semantics<parallel>], iteration_bounds = array<i64: 1>, scalar_prefetch = 0 : i64, scratch_operands = 0 : i64, tpu.core_type = #tpu.core_type<tc>, window_params = [{transform_indices = @transform_0, window_bounds = array<i64: 4, 50, 150>}, {pipeline_mode = #tpu.pipeline_mode<synchronous>, transform_indices = @transform_1, window_bounds = array<i64: 150, 16>}, {pipeline_mode = #tpu.pipeline_mode<synchronous>, transform_indices = @transform_2, window_bounds = array<i64: 1, 16>}, {transform_indices = @transform_3, window_bounds = array<i64: 50, 16>}]} {
    %c0 = arith.constant 0 : index
    %c0_0 = arith.constant 0 : index
    %0 = vector.load %arg2[%c0, %c0_0] : memref<150x16xbf16, #tpu.memory_space<vmem>>, vector<150x16xbf16>
    %c0_1 = arith.constant 0 : index
    %c0_2 = arith.constant 0 : index
    %c0_3 = arith.constant 0 : index
    %1 = vector.load %arg1[%c0_1, %c0_2, %c0_3] : memref<4x50x150xbf16, #tpu.memory_space<vmem>>, vector<1x50x150xbf16>
    %2 = vector.shape_cast %1 : vector<1x50x150xbf16> to vector<50x150xbf16>
    %cst = arith.constant dense<0.000000e+00> : vector<50x16xf32>
    %3 = tpu.matmul %2, %0, %cst {dimension_numbers = #tpu.dot_dimension_numbers<[1], [0], [0], [1], [0, 0, 1, 1], [], []>} : vector<50x150xbf16>, vector<150x16xbf16>, vector<50x16xf32> -> vector<50x16xf32>
    %c1 = arith.constant 1 : index
    %c0_4 = arith.constant 0 : index
    %c0_5 = arith.constant 0 : index
    %4 = vector.load %arg1[%c1, %c0_4, %c0_5] : memref<4x50x150xbf16, #tpu.memory_space<vmem>>, vector<1x50x150xbf16>
    %5 = vector.shape_cast %4 : vector<1x50x150xbf16> to vector<50x150xbf16>
    %cst_6 = arith.constant dense<0.000000e+00> : vector<50x16xf32>
    %6 = tpu.matmul %5, %0, %cst_6 {dimension_numbers = #tpu.dot_dimension_numbers<[1], [0], [0], [1], [0, 0, 1, 1], [], []>} : vector<50x150xbf16>, vector<150x16xbf16>, vector<50x16xf32> -> vector<50x16xf32>
    %7 = arith.maximumf %3, %6 : vector<50x16xf32>
    %c2 = arith.constant 2 : index
    %c0_7 = arith.constant 0 : index
    %c0_8 = arith.constant 0 : index
    %8 = vector.load %arg1[%c2, %c0_7, %c0_8] : memref<4x50x150xbf16, #tpu.memory_space<vmem>>, vector<1x50x150xbf16>
    %9 = vector.shape_cast %8 : vector<1x50x150xbf16> to vector<50x150xbf16>
    %cst_9 = arith.constant dense<0.000000e+00> : vector<50x16xf32>
    %10 = tpu.matmul %9, %0, %cst_9 {dimension_numbers = #tpu.dot_dimension_numbers<[1], [0], [0], [1], [0, 0, 1, 1], [], []>} : vector<50x150xbf16>, vector<150x16xbf16>, vector<50x16xf32> -> vector<50x16xf32>
    %11 = arith.maximumf %7, %10 : vector<50x16xf32>
    %c3 = arith.constant 3 : index
    %c0_10 = arith.constant 0 : index
    %c0_11 = arith.constant 0 : index
    %12 = vector.load %arg1[%c3, %c0_10, %c0_11] : memref<4x50x150xbf16, #tpu.memory_space<vmem>>, vector<1x50x150xbf16>
    %13 = vector.shape_cast %12 : vector<1x50x150xbf16> to vector<50x150xbf16>
    %cst_12 = arith.constant dense<0.000000e+00> : vector<50x16xf32>
    %14 = tpu.matmul %13, %0, %cst_12 {dimension_numbers = #tpu.dot_dimension_numbers<[1], [0], [0], [1], [0, 0, 1, 1], [], []>} : vector<50x150xbf16>, vector<150x16xbf16>, vector<50x16xf32> -> vector<50x16xf32>
    %15 = arith.maximumf %11, %14 : vector<50x16xf32>
    %c0_13 = arith.constant 0 : index
    %c0_14 = arith.constant 0 : index
    %16 = vector.load %arg3[%c0_13, %c0_14] : memref<1x16xf32, #tpu.memory_space<vmem>>, vector<1x16xf32>
    %17 = vector.broadcast %16 : vector<1x16xf32> to vector<50x16xf32>
    %18 = arith.addf %15, %17 : vector<50x16xf32>
    %cst_15 = arith.constant 0.000000e+00 : f32
    %19 = vector.broadcast %cst_15 : f32 to vector<50x16xf32>
    %20 = arith.cmpf ogt, %18, %19 : vector<50x16xf32>
    %cst_16 = arith.constant 2.000000e-01 : f32
    %21 = vector.broadcast %cst_16 : f32 to vector<50x16xf32>
    %22 = arith.mulf %21, %18 : vector<50x16xf32>
    %23 = arith.select %20, %18, %22 : vector<50x16xi1>, vector<50x16xf32>
    %c0_17 = arith.constant 0 : index
    %c0_18 = arith.constant 0 : index
    %24 = vector.load %arg4[%c0_17, %c0_18] : memref<50x16xf32, #tpu.memory_space<vmem>>, vector<50x16xf32>
    tpu.vector_store %arg4[%c0_17, %c0_18], %23 {strides = array<i32>} : memref<50x16xf32, #tpu.memory_space<vmem>>, vector<50x16xf32>,
    return
  }
  func.func @transform_0(%arg0: i32) -> (i32, i32, i32) {
    %c0_i32 = arith.constant 0 : i32
    %c0_i32_0 = arith.constant 0 : i32
    %c0_i32_1 = arith.constant 0 : i32
    return %c0_i32, %arg0, %c0_i32_0 : i32, i32, i32
  }
  func.func @transform_1(%arg0: i32) -> (i32, i32) {
    %c0_i32 = arith.constant 0 : i32
    %c0_i32_0 = arith.constant 0 : i32
    %c0_i32_1 = arith.constant 0 : i32
    return %c0_i32, %c0_i32_0 : i32, i32
  }
  func.func @transform_2(%arg0: i32) -> (i32, i32) {
    %c0_i32 = arith.constant 0 : i32
    %c0_i32_0 = arith.constant 0 : i32
    %c0_i32_1 = arith.constant 0 : i32
    return %c0_i32, %c0_i32_0 : i32, i32
  }
  func.func @transform_3(%arg0: i32) -> (i32, i32) {
    %c0_i32 = arith.constant 0 : i32
    %c0_i32_0 = arith.constant 0 : i32
    return %arg0, %c0_i32 : i32, i32
  }
}

module attributes {stable_mosaic.version = 11 : i64} {
  func.func @_head_kernel(%arg0: i32, %arg1: memref<2x400xf32, #tpu.memory_space<vmem>>, %arg2: memref<400x120xf32, #tpu.memory_space<vmem>>, %arg3: memref<1x120xf32, #tpu.memory_space<vmem>>, %arg4: memref<120x84xf32, #tpu.memory_space<vmem>>, %arg5: memref<1x84xf32, #tpu.memory_space<vmem>>, %arg6: memref<1x84xf32, #tpu.memory_space<vmem>>, %arg7: memref<1x84xf32, #tpu.memory_space<vmem>>, %arg8: memref<84x10xf32, #tpu.memory_space<vmem>>, %arg9: memref<1x10xf32, #tpu.memory_space<vmem>>, %arg10: memref<2x10xf32, #tpu.memory_space<vmem>>) attributes {dimension_semantics = [#tpu.dimension_semantics<arbitrary>], iteration_bounds = array<i64: 1>, scalar_prefetch = 0 : i64, scratch_operands = 0 : i64, tpu.core_type = #tpu.core_type<tc>, window_params = [{pipeline_mode = #tpu.pipeline_mode<synchronous>, transform_indices = @transform_0, window_bounds = array<i64: 2, 400>}, {pipeline_mode = #tpu.pipeline_mode<synchronous>, transform_indices = @transform_1, window_bounds = array<i64: 400, 120>}, {pipeline_mode = #tpu.pipeline_mode<synchronous>, transform_indices = @transform_2, window_bounds = array<i64: 1, 120>}, {pipeline_mode = #tpu.pipeline_mode<synchronous>, transform_indices = @transform_3, window_bounds = array<i64: 120, 84>}, {pipeline_mode = #tpu.pipeline_mode<synchronous>, transform_indices = @transform_4, window_bounds = array<i64: 1, 84>}, {pipeline_mode = #tpu.pipeline_mode<synchronous>, transform_indices = @transform_5, window_bounds = array<i64: 1, 84>}, {pipeline_mode = #tpu.pipeline_mode<synchronous>, transform_indices = @transform_6, window_bounds = array<i64: 1, 84>}, {pipeline_mode = #tpu.pipeline_mode<synchronous>, transform_indices = @transform_7, window_bounds = array<i64: 84, 10>}, {pipeline_mode = #tpu.pipeline_mode<synchronous>, transform_indices = @transform_8, window_bounds = array<i64: 1, 10>}, {pipeline_mode = #tpu.pipeline_mode<synchronous>, transform_indices = @transform_9, window_bounds = array<i64: 2, 10>}]} {
    %c0 = arith.constant 0 : index
    %c0_0 = arith.constant 0 : index
    %0 = vector.load %arg1[%c0, %c0_0] : memref<2x400xf32, #tpu.memory_space<vmem>>, vector<2x400xf32>
    %c0_1 = arith.constant 0 : index
    %c0_2 = arith.constant 0 : index
    %1 = vector.load %arg2[%c0_1, %c0_2] : memref<400x120xf32, #tpu.memory_space<vmem>>, vector<400x120xf32>
    %cst = arith.constant dense<0.000000e+00> : vector<2x120xf32>
    %2 = tpu.matmul %0, %1, %cst {dimension_numbers = #tpu.dot_dimension_numbers<[1], [0], [0], [1], [0, 0, 1, 1], [], []>} : vector<2x400xf32>, vector<400x120xf32>, vector<2x120xf32> -> vector<2x120xf32>
    %c0_3 = arith.constant 0 : index
    %c0_4 = arith.constant 0 : index
    %3 = vector.load %arg3[%c0_3, %c0_4] : memref<1x120xf32, #tpu.memory_space<vmem>>, vector<1x120xf32>
    %4 = vector.broadcast %3 : vector<1x120xf32> to vector<2x120xf32>
    %5 = arith.addf %2, %4 : vector<2x120xf32>
    %cst_5 = arith.constant 0.000000e+00 : f32
    %6 = vector.broadcast %cst_5 : f32 to vector<2x120xf32>
    %7 = arith.cmpf ogt, %5, %6 : vector<2x120xf32>
    %cst_6 = arith.constant 2.000000e-01 : f32
    %8 = vector.broadcast %cst_6 : f32 to vector<2x120xf32>
    %9 = arith.mulf %8, %5 : vector<2x120xf32>
    %10 = arith.select %7, %5, %9 : vector<2x120xi1>, vector<2x120xf32>
    %c0_7 = arith.constant 0 : index
    %c0_8 = arith.constant 0 : index
    %11 = vector.load %arg4[%c0_7, %c0_8] : memref<120x84xf32, #tpu.memory_space<vmem>>, vector<120x84xf32>
    %cst_9 = arith.constant dense<0.000000e+00> : vector<2x84xf32>
    %12 = tpu.matmul %10, %11, %cst_9 {dimension_numbers = #tpu.dot_dimension_numbers<[1], [0], [0], [1], [0, 0, 1, 1], [], []>} : vector<2x120xf32>, vector<120x84xf32>, vector<2x84xf32> -> vector<2x84xf32>
    %c0_10 = arith.constant 0 : index
    %c0_11 = arith.constant 0 : index
    %13 = vector.load %arg5[%c0_10, %c0_11] : memref<1x84xf32, #tpu.memory_space<vmem>>, vector<1x84xf32>
    %14 = vector.broadcast %13 : vector<1x84xf32> to vector<2x84xf32>
    %15 = arith.addf %12, %14 : vector<2x84xf32>
    %c0_12 = arith.constant 0 : index
    %c0_13 = arith.constant 0 : index
    %16 = vector.load %arg6[%c0_12, %c0_13] : memref<1x84xf32, #tpu.memory_space<vmem>>, vector<1x84xf32>
    %17 = vector.broadcast %16 : vector<1x84xf32> to vector<2x84xf32>
    %18 = arith.mulf %15, %17 : vector<2x84xf32>
    %c0_14 = arith.constant 0 : index
    %c0_15 = arith.constant 0 : index
    %19 = vector.load %arg7[%c0_14, %c0_15] : memref<1x84xf32, #tpu.memory_space<vmem>>, vector<1x84xf32>
    %20 = vector.broadcast %19 : vector<1x84xf32> to vector<2x84xf32>
    %21 = arith.addf %18, %20 : vector<2x84xf32>
    %cst_16 = arith.constant 0.000000e+00 : f32
    %22 = vector.broadcast %cst_16 : f32 to vector<2x84xf32>
    %23 = arith.cmpf ogt, %21, %22 : vector<2x84xf32>
    %cst_17 = arith.constant 2.000000e-01 : f32
    %24 = vector.broadcast %cst_17 : f32 to vector<2x84xf32>
    %25 = arith.mulf %24, %21 : vector<2x84xf32>
    %26 = arith.select %23, %21, %25 : vector<2x84xi1>, vector<2x84xf32>
    %c0_18 = arith.constant 0 : index
    %c0_19 = arith.constant 0 : index
    %27 = vector.load %arg8[%c0_18, %c0_19] : memref<84x10xf32, #tpu.memory_space<vmem>>, vector<84x10xf32>
    %cst_20 = arith.constant dense<0.000000e+00> : vector<2x10xf32>
    %28 = tpu.matmul %26, %27, %cst_20 {dimension_numbers = #tpu.dot_dimension_numbers<[1], [0], [0], [1], [0, 0, 1, 1], [], []>} : vector<2x84xf32>, vector<84x10xf32>, vector<2x10xf32> -> vector<2x10xf32>
    %c0_21 = arith.constant 0 : index
    %c0_22 = arith.constant 0 : index
    %29 = vector.load %arg9[%c0_21, %c0_22] : memref<1x10xf32, #tpu.memory_space<vmem>>, vector<1x10xf32>
    %30 = vector.broadcast %29 : vector<1x10xf32> to vector<2x10xf32>
    %31 = arith.addf %28, %30 : vector<2x10xf32>
    %c0_23 = arith.constant 0 : index
    %c0_24 = arith.constant 0 : index
    %32 = vector.load %arg10[%c0_23, %c0_24] : memref<2x10xf32, #tpu.memory_space<vmem>>, vector<2x10xf32>
    tpu.vector_store %arg10[%c0_23, %c0_24], %31 {strides = array<i32>} : memref<2x10xf32, #tpu.memory_space<vmem>>, vector<2x10xf32>,
    return
  }
  func.func @transform_0(%arg0: i32) -> (i32, i32) {
    %c0_i32 = arith.constant 0 : i32
    %c0_i32_0 = arith.constant 0 : i32
    %c0_i32_1 = arith.constant 0 : i32
    return %c0_i32, %c0_i32_0 : i32, i32
  }
  func.func @transform_1(%arg0: i32) -> (i32, i32) {
    %c0_i32 = arith.constant 0 : i32
    %c0_i32_0 = arith.constant 0 : i32
    %c0_i32_1 = arith.constant 0 : i32
    return %c0_i32, %c0_i32_0 : i32, i32
  }
  func.func @transform_2(%arg0: i32) -> (i32, i32) {
    %c0_i32 = arith.constant 0 : i32
    %c0_i32_0 = arith.constant 0 : i32
    %c0_i32_1 = arith.constant 0 : i32
    return %c0_i32, %c0_i32_0 : i32, i32
  }
  func.func @transform_3(%arg0: i32) -> (i32, i32) {
    %c0_i32 = arith.constant 0 : i32
    %c0_i32_0 = arith.constant 0 : i32
    %c0_i32_1 = arith.constant 0 : i32
    return %c0_i32, %c0_i32_0 : i32, i32
  }
  func.func @transform_4(%arg0: i32) -> (i32, i32) {
    %c0_i32 = arith.constant 0 : i32
    %c0_i32_0 = arith.constant 0 : i32
    %c0_i32_1 = arith.constant 0 : i32
    return %c0_i32, %c0_i32_0 : i32, i32
  }
  func.func @transform_5(%arg0: i32) -> (i32, i32) {
    %c0_i32 = arith.constant 0 : i32
    %c0_i32_0 = arith.constant 0 : i32
    %c0_i32_1 = arith.constant 0 : i32
    return %c0_i32, %c0_i32_0 : i32, i32
  }
  func.func @transform_6(%arg0: i32) -> (i32, i32) {
    %c0_i32 = arith.constant 0 : i32
    %c0_i32_0 = arith.constant 0 : i32
    %c0_i32_1 = arith.constant 0 : i32
    return %c0_i32, %c0_i32_0 : i32, i32
  }
  func.func @transform_7(%arg0: i32) -> (i32, i32) {
    %c0_i32 = arith.constant 0 : i32
    %c0_i32_0 = arith.constant 0 : i32
    %c0_i32_1 = arith.constant 0 : i32
    return %c0_i32, %c0_i32_0 : i32, i32
  }
  func.func @transform_8(%arg0: i32) -> (i32, i32) {
    %c0_i32 = arith.constant 0 : i32
    %c0_i32_0 = arith.constant 0 : i32
    %c0_i32_1 = arith.constant 0 : i32
    return %c0_i32, %c0_i32_0 : i32, i32
  }
  func.func @transform_9(%arg0: i32) -> (i32, i32) {
    %c0_i32 = arith.constant 0 : i32
    %c0_i32_0 = arith.constant 0 : i32
    %c0_i32_1 = arith.constant 0 : i32
    return %c0_i32, %c0_i32_0 : i32, i32
  }
}

</mosaic_0001>

<bundles_post_ra>
// kernel: lenet_forward.3
= control target key start
LH: loop header
LB: loop body
LE: loop exit
PB: predicated region body
PF: predicated region fallthrough
CT: control target
= control target key end

     0   :  { %s1108_s12 = smov 0   ;;  %s1110_s13 = smov 0   ;;  %s1237_s0 = inlined_call_operand.vmem [shape: bf16[4,392,25], index: 0, kind: input, shape index: {}]   ;;  %s1238_s1 = inlined_call_operand.vmem [shape: bf16[25,6], index: 1, kind: input, shape index: {}]   ;;  %s1239_s2 = inlined_call_operand.vmem [shape: f32[1,6], index: 2, kind: input, shape index: {}]   ;;  %s1240_s3 = inlined_call_operand.vmem [shape: f32[392,6], index: 3, kind: output, shape index: {}]  }
   0x1   :  { %s1112_s14 = smov 0  }
   0x2 LB: > { %s880_s15 = sadd.s32 4294967295, %s1085_s14   ;;  %s1125_s16 = sadd.s32 1, %s1085_s14   ;;  %s1085_s14 = sphi %s1112_s14, %s1243_s14   ;;  %s1081_s13 = sphi %s1110_s13, %s1242_s13   ;;  %s1077_s12 = sphi %s1108_s12, %s1241_s12  }
   0x3   : > { %s17_s17 = ssub.s32 %s1085_s14, %s1125_s16  ;;  %s20_s18 = sadd.s32 1, %s1081_s13 }
   0x4   : > { %p18_p0 = scmp.eq.s32.totalorder %s17_s17, 0  ;;  %p27_p1 = scmp.ne.s32.totalorder %s1081_s13, %s1077_s12 }
   0x5   : > { %p28_p2 = scmp.eq.s32.totalorder %s1085_s14, 0  ;;  %p883_p4 = scmp.ge.s32.totalorder %s1085_s14, 7 }
   0x6   : > { %s1134_s19 = scalar_select %p18_p0, %s1081_s13, %s20_s18  }
   0x7   : > { %p29_p3 = por %p28_p2, %p27_p1  ;;  %127 = sbr.rel (%p883_p4) target bundleno = 27 (0x1b), region = 24 }
   0xe   : > { %130 = sbr.rel (!%p29_p3) target bundleno = 27 (0x1b), region = 28  ;;  %s132_s20 = sand.u32 (%p29_p3), 1, %s1081_s13  }
   0xf   : > { %s945_s21 = smul.u32 (%p29_p3), 28, %s1085_s14 }
  0x10   : > { %s1018_s22 = smul.u32 (%p29_p3), 112, %s132_s20 }
  0x11   : > { %s1142_s25 = scalar_lea.vmem (%p29_p3), %s1237_s0, %s945_s21 }
  0x12   : > { %v153_v0 = vld [vmem:[%s1142_s25] sm:$0xff] (%p29_p3)   ;;  %v157_v1 = vld [vmem:[%s1142_s25 + $0x8] sm:$0xff] (%p29_p3)   ;;  %v161_v2 = vld [vmem:[%s1142_s25 + $0x10] sm:$0xff] (%p29_p3)   ;;  %s134_s26 = scalar_lea.vmem (%p29_p3), [#allocation2], %s1018_s22 }
  0x13   : > { %154 = vst [vmem:[%s134_s26] sm:$0xff] (%p29_p3), %v153_v0   ;;  %158 = vst [vmem:[%s134_s26 + $0x8] sm:$0xff] (%p29_p3), %v157_v1   ;;  %v165_v3 = vld [vmem:[%s1142_s25 + $0x18] sm:$0xf] (%p29_p3)  ;;  %v167_v4 = vld [vmem:[%s1142_s25 + $0xc4] sm:$0xff] (%p29_p3)  }
  0x14   : > { %162 = vst [vmem:[%s134_s26 + $0x10] sm:$0xff] (%p29_p3), %v161_v2   ;;  %v171_v5 = vld [vmem:[%s1142_s25 + $0xcc] sm:$0xff] (%p29_p3)   ;;  %166 = vst [vmem:[%s134_s26 + $0x18] sm:$0xf] (%p29_p3), %v165_v3  ;;  %v175_v6 = vld [vmem:[%s1142_s25 + $0xd4] sm:$0xff] (%p29_p3)  }
  0x15   : > { %168 = vst [vmem:[%s134_s26 + $0x1c] sm:$0xff] %v167_v4   ;;  %172 = vst [vmem:[%s134_s26 + $0x24] sm:$0xff] %v171_v5   ;;  %v179_v7 = vld [vmem:[%s1142_s25 + $0xdc] sm:$0xf]  ;;  %v181_v8 = vld [vmem:[%s1142_s25 + $0x188] sm:$0xff]  }
  0x16   : > { %176 = vst [vmem:[%s134_s26 + $0x2c] sm:$0xff] %v175_v6   ;;  %180 = vst [vmem:[%s134_s26 + $0x34] sm:$0xf] %v179_v7  ;;  %v185_v9 = vld [vmem:[%s1142_s25 + $0x190] sm:$0xff]   ;;  %v189_v10 = vld [vmem:[%s1142_s25 + $0x198] sm:$0xff]  }
  0x17   : > { %182 = vst [vmem:[%s134_s26 + $0x38] sm:$0xff] %v181_v8   ;;  %v193_v11 = vld [vmem:[%s1142_s25 + $0x1a0] sm:$0xf]  ;;  %186 = vst [vmem:[%s134_s26 + $0x40] sm:$0xff] %v185_v9   ;;  %v195_v12 = vld [vmem:[%s1142_s25 + $0x24c] sm:$0xff]  }
  0x18   : > { %190 = vst [vmem:[%s134_s26 + $0x48] sm:$0xff] %v189_v10   ;;  %194 = vst [vmem:[%s134_s26 + $0x50] sm:$0xf] %v193_v11  ;;  %v199_v13 = vld [vmem:[%s1142_s25 + $0x254] sm:$0xff]   ;;  %v203_v14 = vld [vmem:[%s1142_s25 + $0x25c] sm:$0xff]  }
  0x19   : > { %196 = vst [vmem:[%s134_s26 + $0x54] sm:$0xff] %v195_v12   ;;  %200 = vst [vmem:[%s134_s26 + $0x5c] sm:$0xff] %v199_v13   ;;  %v207_v15 = vld [vmem:[%s1142_s25 + $0x264] sm:$0xf] }
  0x1a   : > { %204 = vst [vmem:[%s134_s26 + $0x64] sm:$0xff] %v203_v14   ;;  %208 = vst [vmem:[%s134_s26 + $0x6c] sm:$0xf] %v207_v15 }
  0x1b PF: > { %p885_p5 = scmp.ge.s32.totalorder %s1085_s14, 1  ;;  %p286_p6 = scmp.lt.s32.totalorder %s1085_s14, 8 }
  0x1d   : > { %p287_p7 = pnand %p885_p5, %p286_p6 }
  0x1e   : > { %v1045_v16 = vld [vmem:[%s1238_s1] sm:$0xff] (!%p287_p7)   ;;  %vm377_vm0 = vcmask (!%p287_p7), 1043456   ;;  %v1046_v17 = vld [vmem:[%s1238_s1 + $0x8] sm:$0x1f] (!%p287_p7)   ;;  %vm378_vm1 = vcmask (!%p287_p7), 1044480   ;;  %s293_s4 = sand.u32 (!%p287_p7), 1, %s1077_s12  }
  0x1f   : > { %290 = sbr.rel (%p287_p7) target bundleno = 289 (0x121), region = 69  ;;  %970 = vmatprep.subr.bf16.mxu0 (!%p287_p7), %v1045_v16  ;;  %982 = vmatprep.subr.bf16.mxu1 (!%p287_p7), %v1045_v16  ;;  %v1087_v18 = vmov (!%p287_p7), 65535   ;;  %vm364_vm2 = vcmask (!%p287_p7), 203776   ;;  %v942_v2 = vld [vmem:[%s1239_s2] ss:$0 sm:$0xff] (!%p287_p7)  ;;  %vm810_vm4 = vcmask (!%p287_p7), 48128  }
  0x20   : > { %971 = vmatpush3.bf16.msra.mxu0 (!%p287_p7), %v1045_v16  ;;  %983 = vmatpush3.bf16.msra.mxu1 (!%p287_p7), %v1045_v16  ;;  %v379_v19 = vsel (!%p287_p7), %vm377_vm0, 4294967295, %v1087_v18  ;;  %s1019_s5 = smul.u32 (!%p287_p7), 112, %s293_s4 }
  0x21   : > { %v380_v20 = vsel (!%p287_p7), %vm378_vm1, %v379_v19, 0  ;;  %s317_s7 = smul.u32 (!%p287_p7), 7, %s880_s15 }
  0x22   : > { %v382_v21 = vand.u32 (!%p287_p7), %v1046_v17, %v380_v20  ;;  %s1169_s6 = scalar_lea.vmem (!%p287_p7), [#allocation2], %s1019_s5 }
  0x23   : > { %v1047_v22 = vld [vmem:[%s1169_s6] sm:$0xff] (!%p287_p7)   ;;  %v1049_v24 = vld [vmem:[%s1169_s6 + $0x8] sm:$0xff] (!%p287_p7)   ;;  %v1051_v26 = vld [vmem:[%s1169_s6 + $0x10] sm:$0xff] (!%p287_p7)   ;;  %p318_p8 = scmp.lt.s32.totalorder (!%p287_p7), %s317_s7, 48 }
  0x24   : > { %972 = vmatprep.subr.bf16.mxu0 (!%p287_p7), %v382_v21  ;;  %984 = vmatprep.subr.bf16.mxu1 (!%p287_p7), %v382_v21  ;;  %v1048_v23 = vld [vmem:[%s1169_s6 + $0x1c] sm:$0xff] (!%p287_p7)   ;;  %v1050_v25 = vld [vmem:[%s1169_s6 + $0x24] sm:$0xff] (!%p287_p7)   ;;  %v1052_v27 = vld [vmem:[%s1169_s6 + $0x2c] sm:$0xff] (!%p287_p7)  }
  0x25   : > { %973 = vmatpush3.bf16.msra.mxu0 (!%p287_p7), %v382_v21  ;;  %985 = vmatpush3.bf16.msra.mxu1 (!%p287_p7), %v382_v21  ;;  %v1053_v28 = vld [vmem:[%s1169_s6 + $0x18] ss:$0 sps:$4 sm:$0xff] (!%p287_p7)   ;;  %v1054_v29 = vld [vmem:[%s1169_s6 + $0x34] ss:$0 sps:$4 sm:$0xff] (!%p287_p7)   ;;  %v1057_v32 = vld [vmem:[%s1169_s6 + $0x40] sm:$0xff] (!%p287_p7)  }
  0x26   : > { %974 = vmatprep.mubr.msk.bf16.mxu0 %vm364_vm2, %v1047_v22  ;;  %986 = vmatprep.mubr.msk.bf16.mxu1 %vm364_vm2, %v1048_v23  ;;  %v1055_v30 = vld [vmem:[%s1169_s6 + $0x38] sm:$0xff]   ;;  %v1059_v34 = vld [vmem:[%s1169_s6 + $0x48] sm:$0xff]   ;;  %v1061_v36 = vld [vmem:[%s1169_s6 + $0x50] ss:$0 sps:$4 sm:$0xff]   ;;  %s1245_s7 = smov (!%p318_p8, %s317_s7), 48 }
  0x27   : > { %994 = vmatprep.subr.bf16.mxu0 %v1045_v16  ;;  %1006 = vmatprep.subr.bf16.mxu1 %v1045_v16  ;;  %v1056_v31 = vld [vmem:[%s1169_s6 + $0x54] sm:$0xff]   ;;  %v1058_v33 = vld [vmem:[%s1169_s6 + $0x5c] sm:$0xff]   ;;  %v1060_v35 = vld [vmem:[%s1169_s6 + $0x64] sm:$0xff]   ;;  %s886_s10 = sshll.u32 %s1245_s7, 3 }
  0x28   : > { %975 = vmatmul.mubr.msk.bf16.vlgmr.msra.gmra.mrb[0].mxu0 %vm364_vm2, %v1049_v24  ;;  %987 = vmatmul.mubr.msk.bf16.vlgmr.msra.gmra.mrb[0].mxu1 %vm364_vm2, %v1050_v25  ;;  %v1062_v37 = vld [vmem:[%s1169_s6 + $0x6c] ss:$0 sps:$4 sm:$0xff]   ;;  %s1211_s14 = scalar_lea.vmem %s1240_s3, %s886_s10 }
  0x29   : > { %995 = vmatpush3.bf16.msra.mxu0 %v1045_v16  ;;  %1007 = vmatpush3.bf16.msra.mxu1 %v1045_v16 }
  0x2a   : > { %978 = vmatprep.mubr.msk.bf16.mxu0 %vm364_vm2, %v1051_v26  ;;  %990 = vmatprep.mubr.msk.bf16.mxu1 %vm364_vm2, %v1052_v27 }
  0x2b   : > { %996 = vmatprep.subr.bf16.mxu0 %v382_v21  ;;  %1008 = vmatprep.subr.bf16.mxu1 %v382_v21 }
  0x2d   : > { %997 = vmatpush3.bf16.msra.mxu0 %v382_v21  ;;  %1009 = vmatpush3.bf16.msra.mxu1 %v382_v21 }
  0x30   : > { %979 = vmatmul.mubr.msk.bf16.gmra.mrb[4].mxu0 %vm364_vm2, %v1053_v28  ;;  %991 = vmatmul.mubr.msk.bf16.gmra.mrb[4].mxu1 %vm364_vm2, %v1054_v29 }
  0x31   : > { %998 = vmatprep.mubr.msk.bf16.mxu0 %vm364_vm2, %v1055_v30  ;;  %1010 = vmatprep.mubr.msk.bf16.mxu1 %vm364_vm2, %v1056_v31 }
  0x38   : > { %999 = vmatmul.mubr.msk.bf16.vlgmr.msra.gmra.mrb[8].mxu0 %vm364_vm2, %v1057_v32  ;;  %1011 = vmatmul.mubr.msk.bf16.vlgmr.msra.gmra.mrb[8].mxu1 %vm364_vm2, %v1058_v33 }
  0x39   : > { %1002 = vmatprep.mubr.msk.bf16.mxu0 %vm364_vm2, %v1059_v34  ;;  %1014 = vmatprep.mubr.msk.bf16.mxu1 %vm364_vm2, %v1060_v35 }
  0x40   : > { %1003 = vmatmul.mubr.msk.bf16.gmra.mrb[12].mxu0 %vm364_vm2, %v1061_v36  ;;  %1015 = vmatmul.mubr.msk.bf16.gmra.mrb[12].mxu1 %vm364_vm2, %v1062_v37 }
  0xfb   : > { %v976_v38 = vpop.f32.mrb[0].mxu0  ;;  %v988_v39 = vpop.f32.mrb[0].mxu1 }
  0xfc   : > { %v552_v40 = vmax.f32 %v976_v38, %v988_v39  ;;  %v418_v41 = vpop.f32.mrb[1].mxu0  ;;  %v520_v42 = vpop.f32.mrb[1].mxu1 }
  0xfd   : > { %v550_v43 = vmax.f32 %v418_v41, %v520_v42  ;;  %v977_v44 = vpop.f32.mrb[2].mxu0  ;;  %v989_v45 = vpop.f32.mrb[2].mxu1 }
  0xfe   : > { %v553_v46 = vmax.f32 %v977_v44, %v989_v45  ;;  %v421_v47 = vpop.f32.mrb[3].mxu0  ;;  %v523_v48 = vpop.f32.mrb[3].mxu1 }
  0xff   : > { %v551_v49 = vmax.f32 %v421_v47, %v523_v48 }
 0x103   : > { %v980_v50 = vpop.f32.mrb[4].mxu0  ;;  %v992_v51 = vpop.f32.mrb[4].mxu1 }
 0x104   : > { %v556_v52 = vmax.f32 %v980_v50, %v992_v51  ;;  %v434_v53 = vpop.f32.mrb[5].mxu0  ;;  %v536_v54 = vpop.f32.mrb[5].mxu1 }
 0x105   : > { %v554_v55 = vmax.f32 %v434_v53, %v536_v54  ;;  %v981_v56 = vpop.f32.mrb[6].mxu0  ;;  %v993_v57 = vpop.f32.mrb[6].mxu1 }
 0x106   : > { %v437_v58 = vpop.f32.mrb[7].mxu0  ;;  %v539_v59 = vpop.f32.mrb[7].mxu1 }
 0x107   : > { %v555_v60 = vmax.f32 %v437_v58, %v539_v59 }
 0x10b   : > { %v1000_v61 = vpop.f32.mrb[8].mxu0  ;;  %v1012_v62 = vpop.f32.mrb[8].mxu1 }
 0x10c   : > { %v661_v63 = vmax.f32 %v552_v40, %v1000_v61  ;;  %v629_v0 = vpop.f32.mrb[9].mxu0  ;;  %v738_v1 = vpop.f32.mrb[9].mxu1 }
 0x10d   : > { %v659_v3 = vmax.f32 %v550_v43, %v629_v0  ;;  %v1001_v4 = vpop.f32.mrb[10].mxu0  ;;  %v1013_v5 = vpop.f32.mrb[10].mxu1 }
 0x10e   : > { %v770_v6 = vmax.f32 %v661_v63, %v1012_v62  ;;  %v662_v7 = vmax.f32 %v553_v46, %v1001_v4  ;;  %v632_v8 = vpop.f32.mrb[11].mxu0  ;;  %v741_v9 = vpop.f32.mrb[11].mxu1 }
 0x10f   : > { %v768_v10 = vmax.f32 %v659_v3, %v738_v1  ;;  %v660_v11 = vmax.f32 %v551_v49, %v632_v8 }
 0x110   : > { %v784_v12 = vadd.f32 %v942_v2, %v770_v6  ;;  %v771_v13 = vmax.f32 %v662_v7, %v1013_v5 }
 0x111   : > { %v782_v14 = vadd.f32 %v942_v2, %v768_v10  ;;  %v769_v15 = vmax.f32 %v660_v11, %v741_v9 }
 0x112   : > { %vm791_vm3 = vcmp.gt.f32.partialorder %v784_v12, 0.0  ;;  %v798_v16 = vmul.f32 0.2, %v784_v12  ;;  %v785_v17 = vadd.f32 %v942_v2, %v771_v13 }
 0x113   : > { %vm789_vm5 = vcmp.gt.f32.partialorder %v782_v14, 0.0  ;;  %v796_v18 = vmul.f32 0.2, %v782_v14  ;;  %v783_v19 = vadd.f32 %v942_v2, %v769_v15  ;;  %v1004_v20 = vpop.f32.mrb[12].mxu0  ;;  %v1016_v21 = vpop.f32.mrb[12].mxu1 }
 0x114   : > { %v805_v22 = vsel %vm791_vm3, %v784_v12, %v798_v16  ;;  %vm792_vm6 = vcmp.gt.f32.partialorder %v785_v17, 0.0  ;;  %v799_v23 = vmul.f32 0.2, %v785_v17  ;;  %v665_v24 = vmax.f32 %v556_v52, %v1004_v20  ;;  %v645_v25 = vpop.f32.mrb[13].mxu0  ;;  %v754_v26 = vpop.f32.mrb[13].mxu1 }
 0x115   : > { %813 = vst.msk [vmem:[%s1211_s14 + $0x10] sm:$0xff] %vm810_vm4, %v805_v22  ;;  %v803_v27 = vsel %vm789_vm5, %v782_v14, %v796_v18  ;;  %vm790_vm7 = vcmp.gt.f32.partialorder %v783_v19, 0.0  ;;  %v797_v28 = vmul.f32 0.2, %v783_v19  ;;  %v663_v29 = vmax.f32 %v554_v55, %v645_v25  ;;  %v1005_v30 = vpop.f32.mrb[14].mxu0  ;;  %v1017_v31 = vpop.f32.mrb[14].mxu1 }
 0x116   : > { %811 = vst.msk [vmem:[%s1211_s14] sm:$0xff] %vm810_vm4, %v803_v27  ;;  %v806_v32 = vsel %vm792_vm6, %v785_v17, %v799_v23  ;;  %v774_v33 = vmax.f32 %v665_v24, %v1016_v21  ;;  %v648_v34 = vpop.f32.mrb[15].mxu0  ;;  %v757_v35 = vpop.f32.mrb[15].mxu1 }
 0x117   : > { %814 = vst.msk [vmem:[%s1211_s14 + $0x18] sm:$0xff] %vm810_vm4, %v806_v32  ;;  %v804_v36 = vsel %vm790_vm7, %v783_v19, %v797_v28  ;;  %v772_v37 = vmax.f32 %v663_v29, %v754_v26  ;;  %v664_v38 = vmax.f32 %v555_v60, %v648_v34 }
 0x118   : > { %812 = vst.msk [vmem:[%s1211_s14 + $0x8] sm:$0xff] %vm810_vm4, %v804_v36  ;;  %v788_v39 = vadd.f32 %v942_v2, %v774_v33 }
 0x119   : > { %v786_v40 = vadd.f32 %v942_v2, %v772_v37  ;;  %v773_v41 = vmax.f32 %v664_v38, %v757_v35 }
 0x11a   : > { %vm795_vm8 = vcmp.gt.f32.partialorder %v788_v39, 0.0  ;;  %v802_v42 = vmul.f32 0.2, %v788_v39 }
 0x11b   : > { %vm793_vm9 = vcmp.gt.f32.partialorder %v786_v40, 0.0  ;;  %v800_v43 = vmul.f32 0.2, %v786_v40  ;;  %v787_v44 = vadd.f32 %v942_v2, %v773_v41 }
 0x11c   : > { %v809_v45 = vsel %vm795_vm8, %v788_v39, %v802_v42 }
 0x11d   : > { %817 = vst.msk [vmem:[%s1211_s14 + $0x30] sm:$0xff] %vm810_vm4, %v809_v45  ;;  %v807_v46 = vsel %vm793_vm9, %v786_v40, %v800_v43  ;;  %vm794_vm10 = vcmp.gt.f32.partialorder %v787_v44, 0.0  ;;  %v801_v47 = vmul.f32 0.2, %v787_v44 }
 0x11e   : > { %815 = vst.msk [vmem:[%s1211_s14 + $0x20] sm:$0xff] %vm810_vm4, %v807_v46 }
 0x11f   : > { %v808_v48 = vsel %vm794_vm10, %v787_v44, %v801_v47 }
 0x120   : > { %816 = vst.msk [vmem:[%s1211_s14 + $0x28] sm:$0xff] %vm810_vm4, %v808_v48 }
 0x121 PF: > { %p10_p9 = scmp.ge.s32.totalorder %s1125_s16, 9   ;;  %s1241_s12 = smov %s1081_s13 }
 0x122   : > { %s1242_s13 = smov %s1134_s19  ;;  %s1243_s14 = smov %s1125_s16 }
 0x123   :  { %12 = sbr.rel (!%p10_p9) target bundleno = 2 (0x2), region = 111 }

// kernel: lenet_forward.4
= control target key start
LH: loop header
LB: loop body
LE: loop exit
PB: predicated region body
PF: predicated region fallthrough
CT: control target
= control target key end

     0   :  { %v767_v0 = vmov 0   ;;  %vm131_vm0 = vcmask 179200   ;;  %vm144_vm1 = vcmask 1042432   ;;  %vm619_vm3 = vcmask 130048   ;;  %s1084_s1 = inlined_call_operand.vmem [shape: bf16[150,16], index: 1, kind: input, shape index: {}]   ;;  %s1085_s0 = inlined_call_operand.vmem [shape: bf16[4,50,150], index: 0, kind: input, shape index: {}]   ;;  %s1086_s2 = inlined_call_operand.vmem [shape: f32[1,16], index: 2, kind: input, shape index: {}]   ;;  %s1087_s3 = inlined_call_operand.vmem [shape: f32[50,16], index: 3, kind: output, shape index: {}]  }
   0x1   :  { %148 = vmatprep.subr.bf16.mxu0 %v767_v0  ;;  %265 = vmatprep.subr.bf16.mxu1 %v767_v0  ;;  %v793_v1 = vld [vmem:[%s1084_s1] sm:$0xff]   ;;  %v800_v2 = vld [vmem:[%s1084_s1 + $0x8] sm:$0xff]   ;;  %v809_v3 = vld [vmem:[%s1084_s1 + $0x10] sm:$0xff]   ;;  %vm626_vm10 = vcmask 123904  }
   0x2   :  { %149 = vmatpush1.bf16.msra.mxu0 %v793_v1  ;;  %266 = vmatpush1.bf16.msra.mxu1 %v793_v1  ;;  %v818_v4 = vld [vmem:[%s1084_s1 + $0x18] sm:$0xff]   ;;  %v725_v5 = vld [vmem:[%s1085_s0 + $0x4] ss:$8 sps:$4 sm:$0xff]   ;;  %v853_v9 = vld [vmem:[%s1084_s1 + $0x30] sm:$0xff]  }
   0x3   :  { %150 = vmatprep.subr.bf16.mxu0 %v767_v0  ;;  %267 = vmatprep.subr.bf16.mxu1 %v767_v0  ;;  %v728_v6 = vld [vmem:[%s1085_s0 + $0x3c] ss:$8 sps:$4 sm:$0xff]   ;;  %v844_v8 = vld [vmem:[%s1084_s1 + $0x28] sm:$0xff]   ;;  %v726_v15 = vld [vmem:[%s1085_s0 + $0x38] ss:$8 sps:$4 sm:$0xff]  }
   0x4   :  { %650 = vmatprep.mubr.msk.bf16.mxu0 %vm131_vm0, %v725_v5  ;;  %v834_v7 = vld [vmem:[%s1084_s1 + $0x20] sm:$0xff]   ;;  %669 = vmatprep.mubr.msk.bf16.mxu1 %vm131_vm0, %v728_v6  ;;  %v862_v10 = vld [vmem:[%s1084_s1 + $0x38] sm:$0xff]   ;;  %v722_v12 = vld [vmem:[%s1084_s1 + $0x48] ss:$0 sps:$4 sm:$0x77]  }
   0x5   :  { %v871_v11 = vld [vmem:[%s1084_s1 + $0x40] sm:$0xff]   ;;  %v882_v13 = vsel %vm144_vm1, %v722_v12, 0  ;;  %v729_v16 = vld [vmem:[%s1085_s0 + $0x14] ss:$8 sps:$4 sm:$0xff]   ;;  %v731_v18 = vld [vmem:[%s1085_s0 + $0x10] ss:$8 sps:$4 sm:$0xff]  }
   0x6   :  { %151 = vmatpush1.bf16.msra.mxu0 %v800_v2  ;;  %268 = vmatpush1.bf16.msra.mxu1 %v800_v2  ;;  %v723_v14 = vld [vmem:[%s1085_s0] ss:$8 sps:$4 sm:$0xff]   ;;  %v732_v17 = vld [vmem:[%s1085_s0 + $0x4c] ss:$8 sps:$4 sm:$0xff]   ;;  %v738_v21 = vld [vmem:[%s1085_s0 + $0x5c] ss:$8 sps:$4 sm:$0xff]  }
   0x7   :  { %152 = vmatprep.subr.bf16.mxu0 %v767_v0  ;;  %269 = vmatprep.subr.bf16.mxu1 %v767_v0  ;;  %v734_v19 = vld [vmem:[%s1085_s0 + $0x48] ss:$8 sps:$4 sm:$0xff]   ;;  %v735_v20 = vld [vmem:[%s1085_s0 + $0x24] ss:$8 sps:$4 sm:$0xff]   ;;  %v740_v23 = vld [vmem:[%s1085_s0 + $0x58] ss:$8 sps:$4 sm:$0xff]  }
   0x8   :  { %v737_v22 = vld [vmem:[%s1085_s0 + $0x20] ss:$8 sps:$4 sm:$0xff]   ;;  %v40_v24 = vld [vmem:[%s1085_s0 + $0x30] sm:$0x11]  ;;  %v751_v34 = vld [vmem:[%s1085_s0 + $0x84] ss:$8 sps:$4 sm:$0xff]  }
   0x9   :  { %v660_v25 = vld [vmem:[%s1085_s0 + $0x68] sm:$0x11]  ;;  %v639_v26 = vcombine.high %v40_v24, %v40_v24  ;;  %v638_v28 = vcombine.low %v40_v24, %v40_v24  ;;  %v747_v30 = vld [vmem:[%s1085_s0 + $0x74] ss:$8 sps:$4 sm:$0xff]   ;;  %v745_v32 = vld [vmem:[%s1085_s0 + $0x70] ss:$8 sps:$4 sm:$0xff]  }
   0xa   :  { %153 = vmatpush1.bf16.msra.mxu0 %v809_v3  ;;  %270 = vmatpush1.bf16.msra.mxu1 %v809_v3  ;;  %v668_v27 = vcombine.high %v660_v25, %v660_v25  ;;  %v667_v29 = vcombine.low %v660_v25, %v660_v25  ;;  %v750_v31 = vld [vmem:[%s1085_s0 + $0xac] ss:$8 sps:$4 sm:$0xff]   ;;  %v748_v33 = vld [vmem:[%s1085_s0 + $0xa8] ss:$8 sps:$4 sm:$0xff]   ;;  %v753_v35 = vld [vmem:[%s1085_s0 + $0xbc] ss:$8 sps:$4 sm:$0xff]  }
   0xb   :  { %154 = vmatprep.subr.bf16.mxu0 %v767_v0  ;;  %271 = vmatprep.subr.bf16.mxu1 %v767_v0  ;;  %v755_v36 = vld [vmem:[%s1085_s0 + $0x80] ss:$8 sps:$4 sm:$0xff]   ;;  %v757_v38 = vld [vmem:[%s1085_s0 + $0x94] ss:$8 sps:$4 sm:$0xff]   ;;  %v761_v42 = vld [vmem:[%s1085_s0 + $0x90] ss:$8 sps:$4 sm:$0xff]  }
   0xc   :  { %v756_v37 = vld [vmem:[%s1085_s0 + $0xb8] ss:$8 sps:$4 sm:$0xff]   ;;  %v759_v39 = vld [vmem:[%s1085_s0 + $0xcc] ss:$8 sps:$4 sm:$0xff]   ;;  %v762_v43 = vld [vmem:[%s1085_s0 + $0xc8] ss:$8 sps:$4 sm:$0xff]  }
   0xd   :  { %v679_v40 = vld [vmem:[%s1085_s0 + $0xa0] sm:$0x11]  ;;  %v698_v41 = vld [vmem:[%s1085_s0 + $0xd8] sm:$0x11] }
   0xe   :  { %155 = vmatpush1.bf16.msra.mxu0 %v818_v4  ;;  %272 = vmatpush1.bf16.msra.mxu1 %v818_v4  ;;  %v687_v44 = vcombine.high %v679_v40, %v679_v40  ;;  %v706_v45 = vcombine.high %v698_v41, %v698_v41  ;;  %v686_v46 = vcombine.low %v679_v40, %v679_v40 }
   0xf   :  { %156 = vmatprep.subr.bf16.mxu0 %v767_v0  ;;  %273 = vmatprep.subr.bf16.mxu1 %v767_v0  ;;  %v705_v47 = vcombine.low %v698_v41, %v698_v41 }
  0x12   :  { %157 = vmatpush1.bf16.msra.mxu0 %v834_v7  ;;  %274 = vmatpush1.bf16.msra.mxu1 %v834_v7 }
  0x13   :  { %158 = vmatprep.subr.bf16.mxu0 %v767_v0  ;;  %275 = vmatprep.subr.bf16.mxu1 %v767_v0 }
  0x16   :  { %159 = vmatpush1.bf16.msra.mxu0 %v844_v8  ;;  %276 = vmatpush1.bf16.msra.mxu1 %v844_v8 }
  0x17   :  { %160 = vmatprep.subr.bf16.mxu0 %v767_v0  ;;  %277 = vmatprep.subr.bf16.mxu1 %v767_v0 }
  0x1a   :  { %161 = vmatpush1.bf16.msra.mxu0 %v853_v9  ;;  %278 = vmatpush1.bf16.msra.mxu1 %v853_v9 }
  0x1b   :  { %162 = vmatprep.subr.bf16.mxu0 %v767_v0  ;;  %279 = vmatprep.subr.bf16.mxu1 %v767_v0 }
  0x1e   :  { %163 = vmatpush1.bf16.msra.mxu0 %v862_v10  ;;  %280 = vmatpush1.bf16.msra.mxu1 %v862_v10 }
  0x1f   :  { %164 = vmatprep.subr.bf16.mxu0 %v767_v0  ;;  %281 = vmatprep.subr.bf16.mxu1 %v767_v0 }
  0x22   :  { %165 = vmatpush1.bf16.msra.mxu0 %v871_v11  ;;  %282 = vmatpush1.bf16.msra.mxu1 %v871_v11 }
  0x23   :  { %166 = vmatprep.subr.bf16.mxu0 %v767_v0  ;;  %283 = vmatprep.subr.bf16.mxu1 %v767_v0 }
  0x26   :  { %167 = vmatpush1.bf16.msra.mxu0 %v882_v13  ;;  %284 = vmatpush1.bf16.msra.mxu1 %v882_v13 }
  0x27   :  { %389 = vmatprep.subr.bf16.mxu0 %v767_v0  ;;  %513 = vmatprep.subr.bf16.mxu1 %v767_v0 }
  0x29   :  { %181 = vmatmul.mubr.bf16.vlgmr.msra.gmra.mrb[0].mxu0 %v723_v14  ;;  %298 = vmatmul.mubr.bf16.vlgmr.msra.gmra.mrb[0].mxu1 %v726_v15 }
  0x2a   :  { %390 = vmatpush1.bf16.msra.mxu0 %v793_v1  ;;  %514 = vmatpush1.bf16.msra.mxu1 %v793_v1 }
  0x2b   :  { %391 = vmatprep.subr.bf16.mxu0 %v767_v0  ;;  %515 = vmatprep.subr.bf16.mxu1 %v767_v0 }
  0x2c   :  { %651 = vmatprep.mubr.msk.bf16.mxu0 %vm131_vm0, %v729_v16  ;;  %670 = vmatprep.mubr.msk.bf16.mxu1 %vm131_vm0, %v732_v17 }
  0x2e   :  { %392 = vmatpush1.bf16.msra.mxu0 %v800_v2  ;;  %516 = vmatpush1.bf16.msra.mxu1 %v800_v2 }
  0x2f   :  { %393 = vmatprep.subr.bf16.mxu0 %v767_v0  ;;  %517 = vmatprep.subr.bf16.mxu1 %v767_v0 }
  0x31   :  { %189 = vmatmul.mubr.bf16.gmra.mrb[4].mxu0 %v731_v18  ;;  %306 = vmatmul.mubr.bf16.gmra.mrb[4].mxu1 %v734_v19 }
  0x32   :  { %394 = vmatpush1.bf16.msra.mxu0 %v809_v3  ;;  %518 = vmatpush1.bf16.msra.mxu1 %v809_v3 }
  0x33   :  { %395 = vmatprep.subr.bf16.mxu0 %v767_v0  ;;  %519 = vmatprep.subr.bf16.mxu1 %v767_v0 }
  0x34   :  { %652 = vmatprep.mubr.msk.bf16.mxu0 %vm131_vm0, %v735_v20  ;;  %671 = vmatprep.mubr.msk.bf16.mxu1 %vm131_vm0, %v738_v21 }
  0x36   :  { %396 = vmatpush1.bf16.msra.mxu0 %v818_v4  ;;  %520 = vmatpush1.bf16.msra.mxu1 %v818_v4 }
  0x37   :  { %397 = vmatprep.subr.bf16.mxu0 %v767_v0  ;;  %521 = vmatprep.subr.bf16.mxu1 %v767_v0 }
  0x39   :  { %197 = vmatmul.mubr.bf16.gmra.mrb[8].mxu0 %v737_v22  ;;  %314 = vmatmul.mubr.bf16.gmra.mrb[8].mxu1 %v740_v23 }
  0x3a   :  { %398 = vmatpush1.bf16.msra.mxu0 %v834_v7  ;;  %522 = vmatpush1.bf16.msra.mxu1 %v834_v7 }
  0x3b   :  { %399 = vmatprep.subr.bf16.mxu0 %v767_v0  ;;  %523 = vmatprep.subr.bf16.mxu1 %v767_v0 }
  0x3c   :  { %653 = vmatprep.mubr.msk.bf16.mxu0 %vm131_vm0, %v639_v26  ;;  %672 = vmatprep.mubr.msk.bf16.mxu1 %vm131_vm0, %v668_v27 }
  0x3e   :  { %400 = vmatpush1.bf16.msra.mxu0 %v844_v8  ;;  %524 = vmatpush1.bf16.msra.mxu1 %v844_v8 }
  0x3f   :  { %401 = vmatprep.subr.bf16.mxu0 %v767_v0  ;;  %525 = vmatprep.subr.bf16.mxu1 %v767_v0 }
  0x41   :  { %205 = vmatmul.mubr.bf16.gmra.mrb[12].mxu0 %v638_v28  ;;  %322 = vmatmul.mubr.bf16.gmra.mrb[12].mxu1 %v667_v29  ;;  %v1039_v28 = vld [vmem:[%s1086_s2] ss:$0 sm:$0xff] }
  0x42   :  { %402 = vmatpush1.bf16.msra.mxu0 %v853_v9  ;;  %526 = vmatpush1.bf16.msra.mxu1 %v853_v9 }
  0x43   :  { %403 = vmatprep.subr.bf16.mxu0 %v767_v0  ;;  %527 = vmatprep.subr.bf16.mxu1 %v767_v0 }
  0x44   :  { %688 = vmatprep.mubr.msk.bf16.mxu0 %vm131_vm0, %v747_v30  ;;  %707 = vmatprep.mubr.msk.bf16.mxu1 %vm131_vm0, %v750_v31 }
  0x46   :  { %404 = vmatpush1.bf16.msra.mxu0 %v862_v10  ;;  %528 = vmatpush1.bf16.msra.mxu1 %v862_v10 }
  0x47   :  { %405 = vmatprep.subr.bf16.mxu0 %v767_v0  ;;  %529 = vmatprep.subr.bf16.mxu1 %v767_v0 }
  0x4a   :  { %406 = vmatpush1.bf16.msra.mxu0 %v871_v11  ;;  %530 = vmatpush1.bf16.msra.mxu1 %v871_v11 }
  0x4b   :  { %407 = vmatprep.subr.bf16.mxu0 %v767_v0  ;;  %531 = vmatprep.subr.bf16.mxu1 %v767_v0 }
  0x4e   :  { %408 = vmatpush1.bf16.msra.mxu0 %v882_v13  ;;  %532 = vmatpush1.bf16.msra.mxu1 %v882_v13 }
  0x51   :  { %422 = vmatmul.mubr.bf16.vlgmr.msra.gmra.mrb[16].mxu0 %v745_v32  ;;  %546 = vmatmul.mubr.bf16.vlgmr.msra.gmra.mrb[16].mxu1 %v748_v33 }
  0x52   :  { %689 = vmatprep.mubr.msk.bf16.mxu0 %vm131_vm0, %v751_v34  ;;  %708 = vmatprep.mubr.msk.bf16.mxu1 %vm131_vm0, %v753_v35 }
  0x59   :  { %430 = vmatmul.mubr.bf16.gmra.mrb[20].mxu0 %v755_v36  ;;  %554 = vmatmul.mubr.bf16.gmra.mrb[20].mxu1 %v756_v37 }
  0x5a   :  { %690 = vmatprep.mubr.msk.bf16.mxu0 %vm131_vm0, %v757_v38  ;;  %709 = vmatprep.mubr.msk.bf16.mxu1 %vm131_vm0, %v759_v39 }
  0x61   :  { %438 = vmatmul.mubr.bf16.gmra.mrb[24].mxu0 %v761_v42  ;;  %562 = vmatmul.mubr.bf16.gmra.mrb[24].mxu1 %v762_v43 }
  0x62   :  { %691 = vmatprep.mubr.msk.bf16.mxu0 %vm131_vm0, %v687_v44  ;;  %710 = vmatprep.mubr.msk.bf16.mxu1 %vm131_vm0, %v706_v45 }
  0x69   :  { %446 = vmatmul.mubr.bf16.gmra.mrb[28].mxu0 %v686_v46  ;;  %570 = vmatmul.mubr.bf16.gmra.mrb[28].mxu1 %v705_v47 }
  0xfc   :  { %v182_v48 = vpop.f32.mrb[0].mxu0  ;;  %v299_v49 = vpop.f32.mrb[0].mxu1 }
  0xfd   :  { %v329_v50 = vmax.f32 %v182_v48, %v299_v49  ;;  %v184_v51 = vpop.f32.mrb[1].mxu0  ;;  %v301_v52 = vpop.f32.mrb[1].mxu1 }
  0xfe   :  { %v185_v53 = vpop.f32.mrb[2].mxu0  ;;  %v302_v54 = vpop.f32.mrb[2].mxu1 }
  0xff   :  { %v330_v55 = vmax.f32 %v185_v53, %v302_v54  ;;  %v187_v56 = vpop.f32.mrb[3].mxu0  ;;  %v304_v57 = vpop.f32.mrb[3].mxu1 }
 0x104   :  { %v190_v58 = vpop.f32.mrb[4].mxu0  ;;  %v307_v59 = vpop.f32.mrb[4].mxu1 }
 0x105   :  { %v192_v60 = vpop.f32.mrb[5].mxu0  ;;  %v331_v61 = vmax.f32 %v190_v58, %v307_v59  ;;  %v309_v62 = vpop.f32.mrb[5].mxu1 }
 0x106   :  { %v193_v63 = vpop.f32.mrb[6].mxu0  ;;  %v310_v0 = vpop.f32.mrb[6].mxu1 }
 0x107   :  { %v195_v1 = vpop.f32.mrb[7].mxu0  ;;  %v332_v2 = vmax.f32 %v193_v63, %v310_v0  ;;  %v312_v3 = vpop.f32.mrb[7].mxu1 }
 0x10c   :  { %v1018_v4 = vpop.f32.mrb[8].mxu0  ;;  %v1020_v5 = vpop.f32.mrb[8].mxu1 }
 0x10d   :  { %v200_v6 = vpop.f32.mrb[9].mxu0  ;;  %v333_v7 = vmax.f32 %v1018_v4, %v1020_v5  ;;  %v317_v8 = vpop.f32.mrb[9].mxu1 }
 0x10e   :  { %v1024_v9 = vpop.f32.mrb[10].mxu0  ;;  %v1026_v10 = vpop.f32.mrb[10].mxu1 }
 0x10f   :  { %v203_v11 = vpop.f32.mrb[11].mxu0  ;;  %v334_v12 = vmax.f32 %v1024_v9, %v1026_v10  ;;  %v320_v13 = vpop.f32.mrb[11].mxu1 }
 0x114   :  { %v1030_v14 = vpop.f32.mrb[12].mxu0  ;;  %v1032_v15 = vpop.f32.mrb[12].mxu1 }
 0x115   :  { %v208_v16 = vpop.f32.mrb[13].mxu0  ;;  %v335_v17 = vmax.f32 %v1030_v14, %v1032_v15  ;;  %v325_v18 = vpop.f32.mrb[13].mxu1 }
 0x116   :  { %v209_v19 = vpop.f32.mrb[14].mxu0  ;;  %v326_v20 = vpop.f32.mrb[14].mxu1 }
 0x117   :  { %v210_v21 = vpop.f32.mrb[15].mxu0  ;;  %v327_v22 = vpop.f32.mrb[15].mxu1 }
 0x124   :  { %v423_v23 = vpop.f32.mrb[16].mxu0  ;;  %v547_v24 = vpop.f32.mrb[16].mxu1 }
 0x125   :  { %v453_v25 = vmax.f32 %v329_v50, %v423_v23  ;;  %v425_v26 = vpop.f32.mrb[17].mxu0  ;;  %v549_v27 = vpop.f32.mrb[17].mxu1 }
 0x126   :  { %v426_v29 = vpop.f32.mrb[18].mxu0  ;;  %v550_v30 = vpop.f32.mrb[18].mxu1 }
 0x127   :  { %v577_v31 = vmax.f32 %v453_v25, %v547_v24  ;;  %v454_v32 = vmax.f32 %v330_v55, %v426_v29  ;;  %v428_v33 = vpop.f32.mrb[19].mxu0  ;;  %v552_v34 = vpop.f32.mrb[19].mxu1 }
 0x129   :  { %v591_v35 = vadd.f32 %v1039_v28, %v577_v31  ;;  %v578_v36 = vmax.f32 %v454_v32, %v550_v30 }
 0x12b   :  { %vm598_vm2 = vcmp.gt.f32.partialorder %v591_v35, 0.0  ;;  %v605_v37 = vmul.f32 0.2, %v591_v35  ;;  %v592_v38 = vadd.f32 %v1039_v28, %v578_v36 }
 0x12c   :  { %v431_v39 = vpop.f32.mrb[20].mxu0  ;;  %v555_v40 = vpop.f32.mrb[20].mxu1 }
 0x12d   :  { %v612_v41 = vsel %vm598_vm2, %v591_v35, %v605_v37  ;;  %vm599_vm4 = vcmp.gt.f32.partialorder %v592_v38, 0.0  ;;  %v606_v42 = vmul.f32 0.2, %v592_v38  ;;  %v455_v43 = vmax.f32 %v331_v61, %v431_v39  ;;  %v433_v44 = vpop.f32.mrb[21].mxu0  ;;  %v557_v45 = vpop.f32.mrb[21].mxu1 }
 0x12e   :  { %620 = vst.msk [vmem:[%s1087_s3] sm:$0xff] %vm619_vm3, %v612_v41  ;;  %v434_v46 = vpop.f32.mrb[22].mxu0  ;;  %v558_v47 = vpop.f32.mrb[22].mxu1 }
 0x12f   :  { %v613_v48 = vsel %vm599_vm4, %v592_v38, %v606_v42  ;;  %v579_v49 = vmax.f32 %v455_v43, %v555_v40  ;;  %v456_v50 = vmax.f32 %v332_v2, %v434_v46  ;;  %v436_v51 = vpop.f32.mrb[23].mxu0  ;;  %v560_v52 = vpop.f32.mrb[23].mxu1 }
 0x130   :  { %621 = vst.msk [vmem:[%s1087_s3 + $0x8] sm:$0xff] %vm619_vm3, %v613_v48 }
 0x131   :  { %v593_v53 = vadd.f32 %v1039_v28, %v579_v49  ;;  %v580_v54 = vmax.f32 %v456_v50, %v558_v47 }
 0x133   :  { %vm600_vm5 = vcmp.gt.f32.partialorder %v593_v53, 0.0  ;;  %v607_v55 = vmul.f32 0.2, %v593_v53  ;;  %v594_v56 = vadd.f32 %v1039_v28, %v580_v54 }
 0x134   :  { %v439_v57 = vpop.f32.mrb[24].mxu0  ;;  %v563_v58 = vpop.f32.mrb[24].mxu1 }
 0x135   :  { %v614_v59 = vsel %vm600_vm5, %v593_v53, %v607_v55  ;;  %vm601_vm6 = vcmp.gt.f32.partialorder %v594_v56, 0.0  ;;  %v608_v60 = vmul.f32 0.2, %v594_v56  ;;  %v457_v61 = vmax.f32 %v333_v7, %v439_v57  ;;  %v441_v62 = vpop.f32.mrb[25].mxu0  ;;  %v565_v63 = vpop.f32.mrb[25].mxu1 }
 0x136   :  { %622 = vst.msk [vmem:[%s1087_s3 + $0x10] sm:$0xff] %vm619_vm3, %v614_v59  ;;  %v442_v0 = vpop.f32.mrb[26].mxu0  ;;  %v566_v1 = vpop.f32.mrb[26].mxu1 }
 0x137   :  { %v615_v2 = vsel %vm601_vm6, %v594_v56, %v608_v60  ;;  %v581_v3 = vmax.f32 %v457_v61, %v563_v58  ;;  %v458_v6 = vmax.f32 %v334_v12, %v442_v0  ;;  %v444_v8 = vpop.f32.mrb[27].mxu0  ;;  %v568_v11 = vpop.f32.mrb[27].mxu1 }
 0x138   :  { %623 = vst.msk [vmem:[%s1087_s3 + $0x18] sm:$0xff] %vm619_vm3, %v615_v2 }
 0x139   :  { %v595_v4 = vadd.f32 %v1039_v28, %v581_v3  ;;  %v582_v5 = vmax.f32 %v458_v6, %v566_v1 }
 0x13b   :  { %vm602_vm7 = vcmp.gt.f32.partialorder %v595_v4, 0.0  ;;  %v609_v7 = vmul.f32 0.2, %v595_v4  ;;  %v596_v13 = vadd.f32 %v1039_v28, %v582_v5 }
 0x13c   :  { %v447_v16 = vpop.f32.mrb[28].mxu0  ;;  %v571_v18 = vpop.f32.mrb[28].mxu1 }
 0x13d   :  { %v616_v19 = vsel %vm602_vm7, %v595_v4, %v609_v7  ;;  %vm603_vm8 = vcmp.gt.f32.partialorder %v596_v13, 0.0  ;;  %v610_v9 = vmul.f32 0.2, %v596_v13  ;;  %v459_v10 = vmax.f32 %v335_v17, %v447_v16  ;;  %v449_v12 = vpop.f32.mrb[29].mxu0  ;;  %v573_v20 = vpop.f32.mrb[29].mxu1 }
 0x13e   :  { %624 = vst.msk [vmem:[%s1087_s3 + $0x20] sm:$0xff] %vm619_vm3, %v616_v19  ;;  %v450_v21 = vpop.f32.mrb[30].mxu0  ;;  %v574_v22 = vpop.f32.mrb[30].mxu1 }
 0x13f   :  { %v617_v23 = vsel %vm603_vm8, %v596_v13, %v610_v9  ;;  %v583_v24 = vmax.f32 %v459_v10, %v571_v18  ;;  %v451_v25 = vpop.f32.mrb[31].mxu0  ;;  %v575_v26 = vpop.f32.mrb[31].mxu1 }
 0x140   :  { %625 = vst.msk [vmem:[%s1087_s3 + $0x28] sm:$0xff] %vm619_vm3, %v617_v23 }
 0x141   :  { %v597_v14 = vadd.f32 %v1039_v28, %v583_v24 }
 0x143   :  { %vm604_vm9 = vcmp.gt.f32.partialorder %v597_v14, 0.0  ;;  %v611_v15 = vmul.f32 0.2, %v597_v14 }
 0x145   :  { %v618_v17 = vsel %vm604_vm9, %v597_v14, %v611_v15 }
 0x146   :  { %627 = vst.msk [vmem:[%s1087_s3 + $0x30] sm:$0x3] %vm626_vm10, %v618_v17 }

// kernel: lenet_forward.5
= control target key start
LH: loop header
LB: loop body
LE: loop exit
PB: predicated region body
PF: predicated region fallthrough
CT: control target
= control target key end

     0   :  { %v740_v4 = vmov 0.0|0.0   ;;  %v741_v26 = vmov 1983009808   ;;  %v96_v28 = vlaneseq  ;;  %vm112_vm0 = vcmask 130048   ;;  %s1074_s0 = inlined_call_operand.vmem [shape: f32[2,400], index: 0, kind: input, shape index: {}]   ;;  %s1075_s1 = inlined_call_operand.vmem [shape: f32[400,120], index: 1, kind: input, shape index: {}]   ;;  %s1076_s2 = inlined_call_operand.vmem [shape: f32[1,120], index: 2, kind: input, shape index: {}]   ;;  %s1077_s3 = inlined_call_operand.vmem [shape: f32[120,84], index: 3, kind: input, shape index: {}]   ;;  %s1078_s4 = inlined_call_operand.vmem [shape: f32[1,84], index: 4, kind: input, shape index: {}]   ;;  %s1079_s5 = inlined_call_operand.vmem [shape: f32[1,84], index: 5, kind: input, shape index: {}]   ;;  %s1080_s6 = inlined_call_operand.vmem [shape: f32[1,84], index: 6, kind: input, shape index: {}]   ;;  %s1081_s7 = inlined_call_operand.vmem [shape: f32[84,10], index: 7, kind: input, shape index: {}]   ;;  %s1082_s8 = inlined_call_operand.vmem [shape: f32[1,10], index: 8, kind: input, shape index: {}]   ;;  %s1083_s9 = inlined_call_operand.hbm [shape: f32[2,10], index: 9, kind: output, shape index: {}]  }
   0x1   :  { %v50_v0 = vld [vmem:[%s1075_s1 + $0x80] sm:$0xff]  ;;  %v51_v1 = vld [vmem:[%s1075_s1 + $0x88] sm:$0xff]  ;;  %647 = vmatprep.subr.bf16.mxu1 %v740_v4  ;;  %v52_v10 = vld [vmem:[%s1075_s1 + $0x90] sm:$0xff]  ;;  %v94_v27 = vunpack.c.l.s4 %v741_v26 }
   0x2   :  { %v34_v2 = vld [vmem:[%s1075_s1] sm:$0xff]  ;;  %v615_v3 = vpack.c.bf16 %v51_v1, %v50_v0  ;;  %v35_v5 = vld [vmem:[%s1075_s1 + $0x8] sm:$0xff]  ;;  %v53_v11 = vld [vmem:[%s1075_s1 + $0x98] sm:$0xff]  ;;  %v97_v39 = vshrl.u32 %v96_v28, 7 }
   0x3   :  { %v66_v6 = vld [vmem:[%s1075_s1 + $0x100] sm:$0xff]  ;;  %v67_v7 = vld [vmem:[%s1075_s1 + $0x108] sm:$0xff]  ;;  %v617_v8 = vpack.c.bf16 %v35_v5, %v34_v2  ;;  %v36_v12 = vld [vmem:[%s1075_s1 + $0x10] sm:$0xff]  ;;  %v619_v13 = vpack.c.bf16 %v53_v11, %v52_v10  ;;  %v95_v38 = vunpack.c.0.s8 %v94_v27 }
   0x4   :  { %v648_v9 = vpack.c.bf16 %v67_v7, %v66_v6  ;;  %616 = vmatprep.subr.bf16.mxu0 %v615_v3  ;;  %v37_v14 = vld [vmem:[%s1075_s1 + $0x18] sm:$0xff]  ;;  %v68_v15 = vld [vmem:[%s1075_s1 + $0x110] sm:$0xff]  ;;  %v54_v19 = vld [vmem:[%s1075_s1 + $0xa0] sm:$0xff] }
   0x5   :  { %v69_v16 = vld [vmem:[%s1075_s1 + $0x118] sm:$0xff]  ;;  %618 = vmatpush3.bf16.msra.mxu0 %v617_v8  ;;  %v621_v17 = vpack.c.bf16 %v37_v14, %v36_v12  ;;  %v55_v20 = vld [vmem:[%s1075_s1 + $0xa8] sm:$0xff]  ;;  %v38_v21 = vld [vmem:[%s1075_s1 + $0x20] sm:$0xff]  ;;  %v98_v49 = vsub.s32 %v95_v38, %v97_v39 }
   0x6   :  { %649 = vmatpush1.bf16.msra.mxu1 %v648_v9  ;;  %v651_v18 = vpack.c.bf16 %v69_v16, %v68_v15  ;;  %620 = vmatprep.subr.bf16.mxu0 %v619_v13  ;;  %v623_v22 = vpack.c.bf16 %v55_v20, %v54_v19  ;;  %v39_v23 = vld [vmem:[%s1075_s1 + $0x28] sm:$0xff]  ;;  %v70_v24 = vld [vmem:[%s1075_s1 + $0x120] sm:$0xff]  ;;  %v56_v29 = vld [vmem:[%s1075_s1 + $0xb0] sm:$0xff] }
   0x7   :  { %650 = vmatprep.subr.bf16.mxu1 %v740_v4  ;;  %v71_v25 = vld [vmem:[%s1075_s1 + $0x128] sm:$0xff]  ;;  %v57_v30 = vld [vmem:[%s1075_s1 + $0xb8] sm:$0xff]  ;;  %v625_v31 = vpack.c.bf16 %v39_v23, %v38_v21  ;;  %v40_v33 = vld [vmem:[%s1075_s1 + $0x30] sm:$0xff] }
   0x8   :  { %v654_v32 = vpack.c.bf16 %v71_v25, %v70_v24  ;;  %v627_v34 = vpack.c.bf16 %v57_v30, %v56_v29  ;;  %v41_v35 = vld [vmem:[%s1075_s1 + $0x38] sm:$0xff]  ;;  %v72_v36 = vld [vmem:[%s1075_s1 + $0x130] sm:$0xff]  ;;  %v58_v40 = vld [vmem:[%s1075_s1 + $0xc0] sm:$0xff] }
   0x9   :  { %622 = vmatpush3.bf16.msra.mxu0 %v621_v17  ;;  %v73_v37 = vld [vmem:[%s1075_s1 + $0x138] sm:$0xff]  ;;  %v59_v41 = vld [vmem:[%s1075_s1 + $0xc8] sm:$0xff]  ;;  %v629_v42 = vpack.c.bf16 %v41_v35, %v40_v33  ;;  %v42_v44 = vld [vmem:[%s1075_s1 + $0x40] sm:$0xff] }
   0xa   :  { %652 = vmatpush1.bf16.msra.mxu1 %v651_v18  ;;  %624 = vmatprep.subr.bf16.mxu0 %v623_v22  ;;  %v657_v43 = vpack.c.bf16 %v73_v37, %v72_v36  ;;  %v631_v45 = vpack.c.bf16 %v59_v41, %v58_v40  ;;  %v43_v46 = vld [vmem:[%s1075_s1 + $0x48] sm:$0xff]  ;;  %v74_v47 = vld [vmem:[%s1075_s1 + $0x140] sm:$0xff]  ;;  %v60_v50 = vld [vmem:[%s1075_s1 + $0xd0] sm:$0xff] }
   0xb   :  { %653 = vmatprep.subr.bf16.mxu1 %v740_v4  ;;  %v75_v48 = vld [vmem:[%s1075_s1 + $0x148] sm:$0xff]  ;;  %v61_v51 = vld [vmem:[%s1075_s1 + $0xd8] sm:$0xff]  ;;  %v633_v52 = vpack.c.bf16 %v43_v46, %v42_v44  ;;  %v44_v54 = vld [vmem:[%s1075_s1 + $0x50] sm:$0xff] }
   0xc   :  { %v660_v53 = vpack.c.bf16 %v75_v48, %v74_v47  ;;  %v33_v55 = vld [vmem:[%s1074_s0] sm:$0xff]  ;;  %v635_v56 = vpack.c.bf16 %v61_v51, %v60_v50  ;;  %v45_v57 = vld [vmem:[%s1075_s1 + $0x58] sm:$0xff]  ;;  %v76_v58 = vld [vmem:[%s1075_s1 + $0x150] sm:$0xff] }
   0xd   :  { %626 = vmatpush3.bf16.msra.mxu0 %v625_v31  ;;  %v77_v59 = vld [vmem:[%s1075_s1 + $0x158] sm:$0xff]  ;;  %v92_v60 = vcombine.high %v33_v55, %v33_v55  ;;  %v99_v61 = vrot.slane %v33_v55, %v98_v49  ;;  %v62_v62 = vld [vmem:[%s1075_s1 + $0xe0] sm:$0xff]  ;;  %v63_v63 = vld [vmem:[%s1075_s1 + $0xe8] sm:$0xff]  ;;  %v637_v2 = vpack.c.bf16 %v45_v57, %v44_v54 }
   0xe   :  { %655 = vmatpush1.bf16.msra.mxu1 %v654_v32  ;;  %628 = vmatprep.subr.bf16.mxu0 %v627_v34  ;;  %v663_v3 = vpack.c.bf16 %v77_v59, %v76_v58  ;;  %v46_v5 = vld [vmem:[%s1075_s1 + $0x60] sm:$0xff] }
   0xf   :  { %656 = vmatprep.subr.bf16.mxu1 %v740_v4  ;;  %v107_v0 = vcombine.high %v99_v61, %v99_v61  ;;  %v106_v1 = vrot.slane %v92_v60, %v98_v49 }
  0x11   :  { %630 = vmatpush3.bf16.msra.mxu0 %v629_v42 }
  0x12   :  { %658 = vmatpush1.bf16.msra.mxu1 %v657_v43  ;;  %632 = vmatprep.subr.bf16.mxu0 %v631_v45 }
  0x13   :  { %659 = vmatprep.subr.bf16.mxu1 %v740_v4 }
  0x15   :  { %634 = vmatpush3.bf16.msra.mxu0 %v633_v52 }
  0x16   :  { %661 = vmatpush1.bf16.msra.mxu1 %v660_v53 }
  0x17   :  { %14 = vsyncpa [#allocation3], 0  ;;  %636 = vmatprep.subr.bf16.mxu0 %v635_v56  ;;  %662 = vmatprep.subr.bf16.mxu1 %v740_v4  ;;  %v639_v6 = vpack.c.bf16 %v63_v63, %v62_v62  ;;  %v47_v7 = vld [vmem:[%s1075_s1 + $0x68] sm:$0xff]  ;;  %v78_v8 = vld [vmem:[%s1075_s1 + $0x160] sm:$0xff]  ;;  %v108_v10 = vcombine.high %v106_v1, %v106_v1  ;;  %v742_v46 = vmov 0.0   ;;  %vm743_vm1 = vmmov 0  }
  0x18   :  { %v79_v9 = vld [vmem:[%s1075_s1 + $0x168] sm:$0xff]  ;;  %v64_v11 = vld [vmem:[%s1075_s1 + $0xf0] sm:$0xff]  ;;  %v65_v12 = vld [vmem:[%s1075_s1 + $0xf8] sm:$0xff]  ;;  %179 = vmatprep.mubr.f32.mxu0 %v107_v0  ;;  %v641_v13 = vpack.c.bf16 %v47_v7, %v46_v5  ;;  %vm280_vm3 = vcmask 982016   ;;  %vm395_vm4 = vcmask 1043456   ;;  %vm391_vm6 = vcmask 687104  }
  0x19   :  { %486 = vmatprep.mubr.msk.f32.mxu1 %vm112_vm0, %v108_v10  ;;  %638 = vmatpush3.bf16.msra.mxu0 %v637_v2  ;;  %v666_v14 = vpack.c.bf16 %v79_v9, %v78_v8  ;;  %v48_v15 = vld [vmem:[%s1075_s1 + $0x70] sm:$0xff]  ;;  %v643_v16 = vpack.c.bf16 %v65_v12, %v64_v11  ;;  %v49_v17 = vld [vmem:[%s1075_s1 + $0x78] sm:$0xff]  ;;  %v82_v22 = vld [vmem:[%s1075_s1 + $0x180] sm:$0xff]  ;;  %s744_s15 = smov [#allocation2]   ;;  %vm469_vm7 = vcmask 74752  }
  0x1a   :  { %664 = vmatpush1.bf16.msra.mxu1 %v663_v3  ;;  %640 = vmatprep.subr.bf16.mxu0 %v639_v6  ;;  %v80_v18 = vld [vmem:[%s1075_s1 + $0x170] sm:$0xff]  ;;  %v81_v19 = vld [vmem:[%s1075_s1 + $0x178] sm:$0xff]  ;;  %v645_v20 = vpack.c.bf16 %v49_v17, %v48_v15  ;;  %v83_v23 = vld [vmem:[%s1075_s1 + $0x188] sm:$0xff]  ;;  %s477_s16 = sshll.u32 %s744_s15, 4  ;;  %s478_s16 = int_to_ptr.vmem [resolvable:$true] %s477_s16 }
  0x1b   :  { %665 = vmatprep.subr.bf16.mxu1 %v740_v4  ;;  %v669_v21 = vpack.c.bf16 %v81_v19, %v80_v18  ;;  %v258_v24 = vld [vmem:[%s1077_s3] sm:$0xff]  ;;  %v259_v25 = vld [vmem:[%s1077_s3 + $0x8] sm:$0xff]  ;;  %v672_v26 = vpack.c.bf16 %v83_v23, %v82_v22  ;;  %v260_v28 = vld [vmem:[%s1077_s3 + $0x10] sm:$0xff]  ;;  %p721_p1 = scmp.lt.s32.totalorder %s478_s16, %s478_s16 }
  0x1c   :  { %v675_v27 = vpack.c.bf16 %v259_v25, %v258_v24  ;;  %v261_v29 = vld [vmem:[%s1077_s3 + $0x18] sm:$0xff]  ;;  %v262_v31 = vld [vmem:[%s1077_s3 + $0x20] sm:$0xff]  ;;  %v263_v32 = vld [vmem:[%s1077_s3 + $0x28] sm:$0xff] }
  0x1d   :  { %642 = vmatpush3.bf16.msra.mxu0 %v641_v13  ;;  %v678_v30 = vpack.c.bf16 %v261_v29, %v260_v28  ;;  %v681_v33 = vpack.c.bf16 %v263_v32, %v262_v31  ;;  %v264_v34 = vld [vmem:[%s1077_s3 + $0x30] sm:$0xff]  ;;  %v265_v35 = vld [vmem:[%s1077_s3 + $0x38] sm:$0xff]  ;;  %v266_v37 = vld [vmem:[%s1077_s3 + $0x40] sm:$0xff] }
  0x1e   :  { %667 = vmatpush1.bf16.msra.mxu1 %v666_v14  ;;  %644 = vmatprep.subr.bf16.mxu0 %v643_v16  ;;  %v684_v36 = vpack.c.bf16 %v265_v35, %v264_v34  ;;  %v267_v38 = vld [vmem:[%s1077_s3 + $0x48] sm:$0xff]  ;;  %v268_v40 = vld [vmem:[%s1077_s3 + $0x50] sm:$0xff]  ;;  %v269_v41 = vld [vmem:[%s1077_s3 + $0x58] sm:$0xff] }
  0x1f   :  { %668 = vmatprep.subr.bf16.mxu1 %v740_v4  ;;  %v687_v39 = vpack.c.bf16 %v267_v38, %v266_v37  ;;  %v690_v42 = vpack.c.bf16 %v269_v41, %v268_v40  ;;  %v270_v43 = vld [vmem:[%s1077_s3 + $0x60] sm:$0xff]  ;;  %v271_v44 = vld [vmem:[%s1077_s3 + $0x68] sm:$0xff]  ;;  %v272_v47 = vld [vmem:[%s1077_s3 + $0x70] sm:$0xff] }
  0x20   :  { %v693_v45 = vpack.c.bf16 %v271_v44, %v270_v43  ;;  %v373_v48 = vld [vmem:[%s1081_s7] sm:$0xff]  ;;  %v374_v49 = vld [vmem:[%s1081_s7 + $0x8] sm:$0xff]  ;;  %v375_v50 = vld [vmem:[%s1081_s7 + $0x10] sm:$0xff] }
  0x21   :  { %646 = vmatpush3.bf16.msra.mxu0 %v645_v20  ;;  %v696_v51 = vpack.c.bf16 %v374_v49, %v373_v48  ;;  %v376_v52 = vld [vmem:[%s1081_s7 + $0x18] sm:$0xff]  ;;  %v377_v54 = vld [vmem:[%s1081_s7 + $0x20] sm:$0xff]  ;;  %v378_v55 = vld [vmem:[%s1081_s7 + $0x28] sm:$0xff] }
  0x22   :  { %670 = vmatpush1.bf16.msra.mxu1 %v669_v21  ;;  %674 = vmatprep.subr.bf16.mxu0 %v740_v4  ;;  %v699_v53 = vpack.c.bf16 %v376_v52, %v375_v50  ;;  %v702_v56 = vpack.c.bf16 %v378_v55, %v377_v54  ;;  %v485_v59 = vld [vmem:[%s1076_s2] ss:$0 sm:$0xff]  ;;  %v379_v3 = vld [vmem:[%s1081_s7 + $0x30] sm:$0xff]  ;;  %v380_v5 = vld [vmem:[%s1081_s7 + $0x38] sm:$0xff] }
  0x23   :  { %671 = vmatprep.subr.bf16.mxu1 %v740_v4  ;;  %v705_v6 = vpack.c.bf16 %v380_v5, %v379_v3  ;;  %v381_v7 = vld [vmem:[%s1081_s7 + $0x40] sm:$0xff]  ;;  %v382_v8 = vld [vmem:[%s1081_s7 + $0x48] sm:$0xff]  ;;  %v383_v10 = vld [vmem:[%s1081_s7 + $0x50] sm:$0xf] }
  0x24   :  { %180 = vmatmul.mubr.f32.vlgmr.msra.gmra.mrb[0].mxu0 %v99_v61  ;;  %v708_v9 = vpack.c.bf16 %v382_v8, %v381_v7  ;;  %v489_v12 = vld [vmem:[%s1079_s5] ss:$0 sm:$0xff]  ;;  %s716_s5 = scalar_lea.vmem %s478_s16, 32 }
  0x25   :  { %676 = vmatpush3.bf16.msra.mxu0 %v675_v27  ;;  %587 = vmatprep.mubr.msk.f32.mxu0 %vm743_vm1, %v742_v46  ;;  %v490_v15 = vld [vmem:[%s1080_s6] ss:$0 sm:$0xff]  ;;  %p717_p0 = scmp.ne.s32.totalorder %s478_s16, %s716_s5  ;;  %p722_p2 = scmp.lt.s32.totalorder %s716_s5, %s716_s5 }
  0x26   :  { %673 = vmatpush1.bf16.msra.mxu1 %v672_v26  ;;  %677 = vmatprep.subr.bf16.mxu0 %v740_v4  ;;  %v491_v20 = vld [vmem:[%s1082_s8] ss:$0 sm:$0xff] }
  0x27   :  { %695 = vmatprep.subr.bf16.mxu1 %v740_v4  ;;  %p723_p3 = por %p722_p2, %p721_p1 }
  0x29   :  { %250 = vmatmul.mubr.f32.vlgmr.msra.gmra.mrb[0].mxu1 %v106_v1  ;;  %679 = vmatpush3.bf16.msra.mxu0 %v678_v30  ;;  %p724_p4 = pnand %p723_p3, %p717_p0 }
  0x2a   :  { %680 = vmatprep.subr.bf16.mxu0 %v740_v4  ;;  %612 = vmatprep.mubr.msk.f32.mxu1 %vm743_vm1, %v742_v46 }
  0x2b   :  { %697 = vmatpush3.bf16.msra.mxu1 %v696_v51 }
  0x2c   :  { %698 = vmatprep.subr.bf16.mxu1 %v740_v4 }
  0x2d   :  { %682 = vmatpush3.bf16.msra.mxu0 %v681_v33 }
  0x2e   :  { %683 = vmatprep.subr.bf16.mxu0 %v740_v4 }
  0x2f   :  { %700 = vmatpush3.bf16.msra.mxu1 %v699_v53 }
  0x30   :  { %701 = vmatprep.subr.bf16.mxu1 %v740_v4 }
  0x31   :  { %685 = vmatpush3.bf16.msra.mxu0 %v684_v36 }
  0x32   :  { %686 = vmatprep.subr.bf16.mxu0 %v740_v4 }
  0x33   :  { %703 = vmatpush3.bf16.msra.mxu1 %v702_v56 }
  0x34   :  { %704 = vmatprep.subr.bf16.mxu1 %v740_v4 }
  0x35   :  { %688 = vmatpush3.bf16.msra.mxu0 %v687_v39 }
  0x36   :  { %689 = vmatprep.subr.bf16.mxu0 %v740_v4 }
  0x37   :  { %706 = vmatpush3.bf16.msra.mxu1 %v705_v6 }
  0x38   :  { %707 = vmatprep.subr.bf16.mxu1 %v740_v4 }
  0x39   :  { %691 = vmatpush3.bf16.msra.mxu0 %v690_v42 }
  0x3a   :  { %692 = vmatprep.subr.bf16.mxu0 %v740_v4  ;;  %v487_v4 = vld [vmem:[%s1078_s4] ss:$0 sm:$0xff] }
  0x3b   :  { %709 = vmatpush3.bf16.msra.mxu1 %v708_v9 }
  0x3c   :  { %610 = vmatprep.subr.mxu1 %v742_v46 }
  0x3d   :  { %694 = vmatpush3.bf16.msra.mxu0 %v693_v45 }
  0x3e   :  { %585 = vmatprep.subr.mxu0 %v742_v46 }
  0x3f   :  { %611 = vmatpush3.msk.msra.mxu1 %vm395_vm4, %v383_v10 }
  0x41   :  { %586 = vmatpush3.msra.mxu0 %v272_v47 }
  0xf7   :  { %v526_v57 = vpop.f32.mrb[0].mxu0 }
  0xf8   :  { %v527_v58 = vpop.f32.mrb[1].mxu0 }
  0xf9   :  { %v528_v60 = vadd.f32 %v527_v58, %v526_v57 }
  0xfb   :  { %v182_v61 = vadd.f32 %v528_v60, %v485_v59 }
  0xfc   :  { %v251_v62 = vpop.f32.mrb[0].mxu1 }
  0xfd   :  { %v253_v63 = vpop.f32.mrb[1].mxu1  ;;  %v252_v0 = vadd.f32 %v251_v62, %v182_v61 }
  0xff   :  { %vm255_vm2 = vcmp.gt.f32.partialorder %v252_v0, 0.0  ;;  %v256_v1 = vmul.f32 0.2, %v252_v0 }
 0x101   :  { %v257_v2 = vsel %vm255_vm2, %v252_v0, %v256_v1 }
 0x102   :  { %588 = vmatmul.mubr.msk.f32.vlgmr.msra.gmra.mrb[2].mxu0 %vm280_vm3, %v257_v2 }
 0x1d5   :  { %v350_v11 = vpop.f32.mrb[2].mxu0 }
 0x1d6   :  { %v351_v13 = vadd.f32 %v487_v4, %v350_v11  ;;  %v589_v14 = vpop.f32.mrb[3].mxu0 }
 0x1d8   :  { %v361_v16 = vmul.f32 %v489_v12, %v351_v13 }
 0x1da   :  { %v369_v17 = vadd.f32 %v490_v15, %v361_v16 }
 0x1dc   :  { %v371_v18 = vmul.f32 0.2, %v369_v17  ;;  %vm370_vm5 = vcmp.gt.f32.partialorder %v369_v17, 0.0 }
 0x1de   :  { %v372_v19 = vsel %vm370_vm5, %v369_v17, %v371_v18 }
 0x1df   :  { %613 = vmatmul.mubr.msk.f32.vlgmr.msra.gmra.mrb[2].mxu1 %vm391_vm6, %v372_v19 }
 0x2b2   :  { %v465_v21 = vpop.f32.mrb[2].mxu1 }
 0x2b3   :  { %v466_v22 = vadd.f32 %v491_v20, %v465_v21  ;;  %v614_v23 = vpop.f32.mrb[3].mxu1 }
 0x2b5   :  { %470 = vst.msk [vmem:[#allocation2] sm:$0x3] %vm469_vm7, %v466_v22 }
 0x2b6   :  { %727 = shalt.err (!%p724_p4)
}
 0x2b7   :  { %s728_s3 = scalar_lea.hbm %s1083_s9, 32 }
 0x2b8   :  { %p729_p5 = scmp.ne.s32.totalorder %s1083_s9, %s728_s3  ;;  %p732_p6 = scmp.lt.u32.totalorder %s728_s3, %s1083_s9 }
 0x2ba   :  { %p734_p7 = pnand %p732_p6, %p729_p5 }
 0x2bc   :  { %737 = shalt.err (!%p734_p7)
}
 0x2bd   :  { %480 = dma.vmem_to_hbm [thread:$0]  %s478_s16, 32, %s1083_s9, [#allocation3]  }
 0x2be   :  { %738 = dma.done.wait [#allocation3], 32  }
 0x2bf   :  { %739 = vsyncadd [#allocation3], 4294967264 }
 0x2c0   :  { %484 = vsyncpa [#allocation3], 1 }

</bundles_post_ra>
